<compile_context>
chip_gen: v7x
topology: tpu7x:2x2x1
jax: 0.10.0
libtpu: 0.0.40
codegen_flags: <defaults>
</compile_context>

<pallas_src>
import jax
import jax.numpy as jnp
from jax.experimental import pallas as pl
from jax.experimental.pallas import tpu as pltpu


# ---------------------------------------------------------------------------
# Phase 1: dense -> BatchNorm1d -> W_ih matmul, gridded over time.
# ---------------------------------------------------------------------------
def precompute_kernel(x_ref, wdT_ref, bd_ref, gamma_ref, beta_ref,
                      wihT_ref, bl_ref, gx_ref):
    t = pl.program_id(0)

    # dense: (B, C) @ (C, R) -> (B, R); bf16 MXU inputs, f32 accumulation.
    y = jnp.dot(x_ref[0], wdT_ref[...],
                preferred_element_type=jnp.float32) + bd_ref[...]

    # BatchNorm1d, training-mode batch stats.  Channel axis == time axis, so
    # for grid step t the stats reduce over the full (B, R) tile (biased var).
    mean = jnp.mean(y, axis=(0, 1), keepdims=True)
    var = jnp.mean((y - mean) ** 2, axis=(0, 1), keepdims=True)
    yn = (y - mean) * jax.lax.rsqrt(var + 1e-5)
    yn = yn * gamma_ref[t] + beta_ref[t]          # per-t scalars from SMEM

    # Input-to-hidden LSTM matmul + fused (b_ih + b_hh) bias.
    gx_ref[0] = jnp.dot(yn.astype(jnp.bfloat16), wihT_ref[...],
                        preferred_element_type=jnp.float32) + bl_ref[...]


# ---------------------------------------------------------------------------
# Phase 2: serial-in-time LSTM recurrence + fc + softmax, gridded over batch.
# ---------------------------------------------------------------------------
def recurrence_kernel(gx_ref, whhT_ref, wfcT_ref, bfc_ref, out_ref):
    T, bb, G = gx_ref.shape
    H = whhT_ref.shape[0]
    whhT = whhT_ref[...]

    # Lane masks for one fused full-vreg gate activation (hoisted out of the
    # loop): sigmoid on the [i, f, o] lanes, tanh on the g lanes recovered via
    # tanh(z) = 2 * sigmoid(2z) - 1.
    col = jax.lax.broadcasted_iota(jnp.int32, (bb, G), 1)
    is_g = (col >= 2 * H) & (col < 3 * H)
    pre_scale = jnp.where(is_g, 2.0, 1.0).astype(jnp.float32)
    post_scale = jnp.where(is_g, 2.0, 1.0).astype(jnp.float32)
    post_shift = jnp.where(is_g, -1.0, 0.0).astype(jnp.float32)

    def step(t, carry):
        h, c = carry
        z = gx_ref[t] + jnp.dot(h, whhT, preferred_element_type=jnp.float32)
        # Single wide EUP chain per step instead of four narrow 32-lane ones;
        # approx reciprocal stays in the EUP slot.
        s = pl.reciprocal(1.0 + jnp.exp(-(z * pre_scale)), approx=True)
        a = s * post_scale + post_shift            # activated [i, f, g, o]
        i = a[:, 0 * H:1 * H]
        f = a[:, 1 * H:2 * H]
        g = a[:, 2 * H:3 * H]
        o = a[:, 3 * H:4 * H]
        c_new = f * c + i * g
        h_new = o * jnp.tanh(c_new)
        return (h_new, c_new)

    h0 = jnp.zeros((bb, H), jnp.float32)
    c0 = jnp.zeros((bb, H), jnp.float32)
    # T is static and small -> full unroll gives the scheduler cross-iteration
    # visibility (gx load / MXU push of step t+1 under step t's EUP chain).
    h_last, _ = jax.lax.fori_loop(0, T, step, (h0, c0), unroll=True)

    # fc + softmax(dim=1).  Off the critical path; keep exact division.
    logits = jnp.dot(h_last, wfcT_ref[...],
                     preferred_element_type=jnp.float32) + bfc_ref[...]
    logits = logits - jnp.max(logits, axis=1, keepdims=True)
    e = jnp.exp(logits)
    out_ref[...] = (e / jnp.sum(e, axis=1, keepdims=True)).astype(out_ref.dtype)


# ---------------------------------------------------------------------------
# Wrappers
# ---------------------------------------------------------------------------
def prepare_params(params):
    """One-time parameter prep: transposes, bias fusion, dtype casts."""
    wd, bd, gamma, beta, wih, whh, bih, bhh, wfc, bfc = params
    R = wd.shape[0]
    H = whh.shape[1]
    return dict(
        wdT=wd.T.astype(jnp.bfloat16),                     # (C, R)
        bd=bd.reshape(1, R).astype(jnp.float32),           # (1, R)
        gamma=gamma.astype(jnp.float32),                   # (R,) == (T,)
        beta=beta.astype(jnp.float32),
        wihT=wih.T.astype(jnp.bfloat16),                   # (R, 4H)
        b_lstm=(bih + bhh).reshape(1, 4 * H).astype(jnp.float32),
        whhT=whh.T.astype(jnp.float32),                    # (H, 4H) f32 (recurrent path)
        wfcT=wfc.T.astype(jnp.float32),                    # (H, 4)
        bfc=bfc.reshape(1, 4).astype(jnp.float32),
    )


def blstm_forward(x, prep, *, batch_block=None):
    """x: (B, T, C) float32, PyTorch batch_first convention.  Returns (B, 4)."""
    B, T, C = x.shape
    R = prep["wdT"].shape[1]
    H = prep["whhT"].shape[0]
    assert T == R, "BatchNorm1d(R) on a 3-D (B, T, R) tensor requires T == R"

    # Time-major so both kernels tile / dynamically index the leading (time)
    # axis while the trailing (B, C)/(B, 4H) dims stay sublane/lane aligned.
    x_tbc = jnp.transpose(x, (1, 0, 2)).astype(jnp.bfloat16)      # (T, B, C)

    vmem = pl.BlockSpec(memory_space=pltpu.MemorySpace.VMEM)
    smem = pl.BlockSpec(memory_space=pltpu.MemorySpace.SMEM)
    cparams = pltpu.CompilerParams(
        dimension_semantics=("parallel",),
        vmem_limit_bytes=32 * 1024 * 1024,   # explicit, safe on v5e/v6e/v7x
    )

    # ---- Phase 1: pipelined precompute over T ------------------------------
    gx = pl.pallas_call(
        precompute_kernel,
        out_shape=jax.ShapeDtypeStruct((T, B, 4 * H), jnp.float32),
        grid=(T,),
        in_specs=[
            pl.BlockSpec((1, B, C), lambda t: (t, 0, 0)),   # x tile (pipelined)
            vmem,                                            # wdT
            vmem,                                            # bd
            smem,                                            # gamma (per-t scalar)
            smem,                                            # beta
            vmem,                                            # wihT
            vmem,                                            # b_ih + b_hh
        ],
        out_specs=pl.BlockSpec((1, B, 4 * H), lambda t: (t, 0, 0)),
        compiler_params=cparams,
    )(x_tbc, prep["wdT"], prep["bd"], prep["gamma"], prep["beta"],
      prep["wihT"], prep["b_lstm"])

    # ---- Phase 2: recurrence, batch-parallel grid ---------------------------
    if batch_block is None:
        batch_block = B if B <= 128 else 128
    assert B % batch_block == 0

    out = pl.pallas_call(
        recurrence_kernel,
        out_shape=jax.ShapeDtypeStruct((B, 4), jnp.float32),
        grid=(B // batch_block,),
        in_specs=[
            pl.BlockSpec((T, batch_block, 4 * H), lambda i: (0, i, 0)),
            vmem,                                            # whhT
            vmem,                                            # wfcT
            vmem,                                            # bfc
        ],
        out_specs=pl.BlockSpec((batch_block, 4), lambda i: (i, 0)),
        compiler_params=cparams,
    )(gx, prep["whhT"], prep["wfcT"], prep["bfc"])
    return out


# ---------------------------------------------------------------------------
# Parameter init + pure-JAX reference (for a sanity check in __main__).
# ---------------------------------------------------------------------------
def init_params(key, num_channels, num_reduced_channels, lstm_cells):
    C, R, H = num_channels, num_reduced_channels, lstm_cells
    ks = jax.random.split(key, 10)
    s = 0.1
    wd = s * jax.random.normal(ks[0], (R, C), jnp.float32)        # dense.weight
    bd = s * jax.random.normal(ks[1], (R,), jnp.float32)          # dense.bias
    gamma = 1.0 + s * jax.random.normal(ks[2], (R,), jnp.float32)  # bn.weight
    beta = s * jax.random.normal(ks[3], (R,), jnp.float32)        # bn.bias
    wih = s * jax.random.normal(ks[4], (4 * H, R), jnp.float32)   # weight_ih_l0
    whh = s * jax.random.normal(ks[5], (4 * H, H), jnp.float32)   # weight_hh_l0
    bih = s * jax.random.normal(ks[6], (4 * H,), jnp.float32)     # bias_ih_l0
    bhh = s * jax.random.normal(ks[7], (4 * H,), jnp.float32)     # bias_hh_l0
    wfc = s * jax.random.normal(ks[8], (4, H), jnp.float32)       # fc.weight
    bfc = s * jax.random.normal(ks[9], (4,), jnp.float32)         # fc.bias
    return (wd, bd, gamma, beta, wih, whh, bih, bhh, wfc, bfc)


def reference_forward(x, params):
    """Pure-JAX f32 reference of the PyTorch module forward."""
    wd, bd, gamma, beta, wih, whh, bih, bhh, wfc, bfc = params
    B, T, C = x.shape
    H = whh.shape[1]
    y = jnp.einsum("btc,rc->btr", x, wd) + bd                     # (B, T, R)
    mean = jnp.mean(y, axis=(0, 2), keepdims=True)                # channel==T
    var = jnp.mean((y - mean) ** 2, axis=(0, 2), keepdims=True)
    y = (y - mean) / jnp.sqrt(var + 1e-5) * gamma[None, :, None] + beta[None, :, None]

    def step(carry, y_t):
        h, c = carry
        z = y_t @ wih.T + h @ whh.T + bih + bhh
        i = jax.nn.sigmoid(z[:, 0 * H:1 * H])
        f = jax.nn.sigmoid(z[:, 1 * H:2 * H])
        g = jnp.tanh(z[:, 2 * H:3 * H])
        o = jax.nn.sigmoid(z[:, 3 * H:4 * H])
        c = f * c + i * g
        h = o * jnp.tanh(c)
        return (h, c), None

    (h, _), _ = jax.lax.scan(step,
                             (jnp.zeros((B, H), jnp.float32),
                              jnp.zeros((B, H), jnp.float32)),
                             jnp.transpose(y, (1, 0, 2)))
    logits = h @ wfc.T + bfc
    return jax.nn.softmax(logits, axis=1)


if __name__ == "__main__":
    # seq_len (T) must equal num_reduced_channels (R) for the PyTorch
    # BatchNorm1d call on a (B, T, R) tensor to be valid.
    B, T, C, R, H = 8, 16, 32, 16, 32

    key = jax.random.PRNGKey(0)
    kx, kp = jax.random.split(key)
    x = jax.random.normal(kx, (B, T, C), jnp.float32)
    params = init_params(kp, C, R, H)
    prep = prepare_params(params)

    out = jax.block_until_ready(jax.jit(blstm_forward)(x, prep))

    assert out.shape == (B, 4)
    # softmax rows sum to 1 (exact division used for the final softmax).
    assert jnp.allclose(jnp.sum(out, axis=1), 1.0, atol=1e-4)

    # Loose check against the f32 pure-JAX reference (kernel uses bf16 MXU
    # inputs + approx reciprocal on the recurrence path).
    ref = jax.block_until_ready(reference_forward(x, params))
    assert jnp.allclose(out, ref, atol=2e-2), float(jnp.max(jnp.abs(out - ref)))

    print("KERNEL_OK")
</pallas_src>

<mosaic_0001>
module attributes {stable_mosaic.version = 11 : i64} {
  func.func @precompute_kernel(%arg0: i32, %arg1: memref<1x8x32xbf16, #tpu.memory_space<vmem>>, %arg2: memref<32x16xbf16, #tpu.memory_space<vmem>>, %arg3: memref<1x16xf32, #tpu.memory_space<vmem>>, %arg4: memref<16xf32, #tpu.memory_space<smem>>, %arg5: memref<16xf32, #tpu.memory_space<smem>>, %arg6: memref<16x128xbf16, #tpu.memory_space<vmem>>, %arg7: memref<1x128xf32, #tpu.memory_space<vmem>>, %arg8: memref<1x8x128xf32, #tpu.memory_space<vmem>>) attributes {dimension_semantics = [#tpu.dimension_semantics<parallel>], iteration_bounds = array<i64: 16>, scalar_prefetch = 0 : i64, scratch_operands = 0 : i64, tpu.core_type = #tpu.core_type<tc>, window_params = [{transform_indices = @transform_0, window_bounds = array<i64: 1, 8, 32>}, {pipeline_mode = #tpu.pipeline_mode<synchronous>, transform_indices = @transform_1, window_bounds = array<i64: 32, 16>}, {pipeline_mode = #tpu.pipeline_mode<synchronous>, transform_indices = @transform_2, window_bounds = array<i64: 1, 16>}, {transform_indices = @transform_3, window_bounds = array<i64: 16>}, {transform_indices = @transform_4, window_bounds = array<i64: 16>}, {pipeline_mode = #tpu.pipeline_mode<synchronous>, transform_indices = @transform_5, window_bounds = array<i64: 16, 128>}, {pipeline_mode = #tpu.pipeline_mode<synchronous>, transform_indices = @transform_6, window_bounds = array<i64: 1, 128>}, {transform_indices = @transform_7, window_bounds = array<i64: 1, 8, 128>}]} {
    %c0 = arith.constant 0 : index
    %c0_0 = arith.constant 0 : index
    %c0_1 = arith.constant 0 : index
    %0 = vector.load %arg1[%c0, %c0_0, %c0_1] : memref<1x8x32xbf16, #tpu.memory_space<vmem>>, vector<1x8x32xbf16>
    %1 = vector.shape_cast %0 : vector<1x8x32xbf16> to vector<8x32xbf16>
    %c0_2 = arith.constant 0 : index
    %c0_3 = arith.constant 0 : index
    %2 = vector.load %arg2[%c0_2, %c0_3] : memref<32x16xbf16, #tpu.memory_space<vmem>>, vector<32x16xbf16>
    %cst = arith.constant dense<0.000000e+00> : vector<8x16xf32>
    %3 = tpu.matmul %1, %2, %cst {dimension_numbers = #tpu.dot_dimension_numbers<[1], [0], [0], [1], [0, 0, 1, 1], [], []>} : vector<8x32xbf16>, vector<32x16xbf16>, vector<8x16xf32> -> vector<8x16xf32>
    %c0_4 = arith.constant 0 : index
    %c0_5 = arith.constant 0 : index
    %4 = vector.load %arg3[%c0_4, %c0_5] : memref<1x16xf32, #tpu.memory_space<vmem>>, vector<1x16xf32>
    %5 = vector.broadcast %4 : vector<1x16xf32> to vector<8x16xf32>
    %6 = arith.addf %3, %5 : vector<8x16xf32>
    %7 = vector.shape_cast %6 : vector<8x16xf32> to vector<1x8x16xf32>
    %cst_6 = arith.constant dense<0.000000e+00> : vector<1xf32>
    %8 = vector.multi_reduction <add>, %7, %cst_6 [1, 2] : vector<1x8x16xf32> to vector<1xf32>
    %9 = vector.shape_cast %8 : vector<1xf32> to vector<1x1x1xf32>
    %10 = vector.extract %9[0, 0, 0] : f32 from vector<1x1x1xf32>
    %11 = vector.broadcast %10 : f32 to vector<1x1xf32>
    %cst_7 = arith.constant 1.280000e+02 : f32
    %12 = vector.broadcast %cst_7 : f32 to vector<1x1xf32>
    %13 = arith.divf %11, %12 : vector<1x1xf32>
    %14 = vector.broadcast %13 : vector<1x1xf32> to vector<8x16xf32>
    %15 = arith.subf %6, %14 : vector<8x16xf32>
    %16 = arith.mulf %15, %15 : vector<8x16xf32>
    %17 = vector.shape_cast %16 : vector<8x16xf32> to vector<1x8x16xf32>
    %cst_8 = arith.constant dense<0.000000e+00> : vector<1xf32>
    %18 = vector.multi_reduction <add>, %17, %cst_8 [1, 2] : vector<1x8x16xf32> to vector<1xf32>
    %19 = vector.shape_cast %18 : vector<1xf32> to vector<1x1x1xf32>
    %20 = vector.extract %19[0, 0, 0] : f32 from vector<1x1x1xf32>
    %21 = vector.broadcast %20 : f32 to vector<1x1xf32>
    %cst_9 = arith.constant 1.280000e+02 : f32
    %22 = vector.broadcast %cst_9 : f32 to vector<1x1xf32>
    %23 = arith.divf %21, %22 : vector<1x1xf32>
    %24 = vector.broadcast %13 : vector<1x1xf32> to vector<8x16xf32>
    %25 = arith.subf %6, %24 : vector<8x16xf32>
    %cst_10 = arith.constant 9.99999974E-6 : f32
    %26 = vector.broadcast %cst_10 : f32 to vector<1x1xf32>
    %27 = arith.addf %23, %26 : vector<1x1xf32>
    %28 = math.rsqrt %27 : vector<1x1xf32>
    %29 = vector.broadcast %28 : vector<1x1xf32> to vector<8x16xf32>
    %30 = arith.mulf %25, %29 : vector<8x16xf32>
    %31 = arith.index_cast %arg0 : i32 to index
    %32 = memref.load %arg4[%31] : memref<16xf32, #tpu.memory_space<smem>>
    %33 = vector.broadcast %32 : f32 to vector<8x16xf32>
    %34 = arith.mulf %30, %33 : vector<8x16xf32>
    %35 = arith.index_cast %arg0 : i32 to index
    %36 = memref.load %arg5[%35] : memref<16xf32, #tpu.memory_space<smem>>
    %37 = vector.broadcast %36 : f32 to vector<8x16xf32>
    %38 = arith.addf %34, %37 : vector<8x16xf32>
    %39 = arith.truncf %38 : vector<8x16xf32> to vector<8x16xbf16>
    %c0_11 = arith.constant 0 : index
    %c0_12 = arith.constant 0 : index
    %40 = vector.load %arg6[%c0_11, %c0_12] : memref<16x128xbf16, #tpu.memory_space<vmem>>, vector<16x128xbf16>
    %cst_13 = arith.constant dense<0.000000e+00> : vector<8x128xf32>
    %41 = tpu.matmul %39, %40, %cst_13 {dimension_numbers = #tpu.dot_dimension_numbers<[1], [0], [0], [1], [0, 0, 1, 1], [], []>} : vector<8x16xbf16>, vector<16x128xbf16>, vector<8x128xf32> -> vector<8x128xf32>
    %c0_14 = arith.constant 0 : index
    %c0_15 = arith.constant 0 : index
    %42 = vector.load %arg7[%c0_14, %c0_15] : memref<1x128xf32, #tpu.memory_space<vmem>>, vector<1x128xf32>
    %43 = vector.broadcast %42 : vector<1x128xf32> to vector<8x128xf32>
    %44 = arith.addf %41, %43 : vector<8x128xf32>
    %c0_16 = arith.constant 0 : index
    %c0_17 = arith.constant 0 : index
    %c0_18 = arith.constant 0 : index
    %45 = vector.load %arg8[%c0_16, %c0_17, %c0_18] : memref<1x8x128xf32, #tpu.memory_space<vmem>>, vector<1x8x128xf32>
    %46 = vector.shape_cast %45 : vector<1x8x128xf32> to vector<8x128xf32>
    %47 = vector.shape_cast %44 : vector<8x128xf32> to vector<1x8x128xf32>
    tpu.vector_store %arg8[%c0_16, %c0_17, %c0_18], %47 {strides = array<i32>} : memref<1x8x128xf32, #tpu.memory_space<vmem>>, vector<1x8x128xf32>,
    return
  }
  func.func @transform_0(%arg0: i32) -> (i32, i32, i32) {
    %c0_i32 = arith.constant 0 : i32
    %c0_i32_0 = arith.constant 0 : i32
    %c0_i32_1 = arith.constant 0 : i32
    return %arg0, %c0_i32, %c0_i32_0 : i32, i32, i32
  }
  func.func @transform_1(%arg0: i32) -> (i32, i32) {
    %c0_i32 = arith.constant 0 : i32
    %c0_i32_0 = arith.constant 0 : i32
    %c0_i32_1 = arith.constant 0 : i32
    return %c0_i32, %c0_i32_0 : i32, i32
  }
  func.func @transform_2(%arg0: i32) -> (i32, i32) {
    %c0_i32 = arith.constant 0 : i32
    %c0_i32_0 = arith.constant 0 : i32
    %c0_i32_1 = arith.constant 0 : i32
    return %c0_i32, %c0_i32_0 : i32, i32
  }
  func.func @transform_3(%arg0: i32) -> i32 {
    %c0_i32 = arith.constant 0 : i32
    %c0_i32_0 = arith.constant 0 : i32
    return %c0_i32 : i32
  }
  func.func @transform_4(%arg0: i32) -> i32 {
    %c0_i32 = arith.constant 0 : i32
    %c0_i32_0 = arith.constant 0 : i32
    return %c0_i32 : i32
  }
  func.func @transform_5(%arg0: i32) -> (i32, i32) {
    %c0_i32 = arith.constant 0 : i32
    %c0_i32_0 = arith.constant 0 : i32
    %c0_i32_1 = arith.constant 0 : i32
    return %c0_i32, %c0_i32_0 : i32, i32
  }
  func.func @transform_6(%arg0: i32) -> (i32, i32) {
    %c0_i32 = arith.constant 0 : i32
    %c0_i32_0 = arith.constant 0 : i32
    %c0_i32_1 = arith.constant 0 : i32
    return %c0_i32, %c0_i32_0 : i32, i32
  }
  func.func @transform_7(%arg0: i32) -> (i32, i32, i32) {
    %c0_i32 = arith.constant 0 : i32
    %c0_i32_0 = arith.constant 0 : i32
    %c0_i32_1 = arith.constant 0 : i32
    return %arg0, %c0_i32, %c0_i32_0 : i32, i32, i32
  }
}

module attributes {stable_mosaic.version = 11 : i64} {
  func.func @recurrence_kernel(%arg0: i32, %arg1: memref<16x8x128xf32, #tpu.memory_space<vmem>>, %arg2: memref<32x128xf32, #tpu.memory_space<vmem>>, %arg3: memref<32x4xf32, #tpu.memory_space<vmem>>, %arg4: memref<1x4xf32, #tpu.memory_space<vmem>>, %arg5: memref<8x4xf32, #tpu.memory_space<vmem>>) attributes {dimension_semantics = [#tpu.dimension_semantics<parallel>], iteration_bounds = array<i64: 1>, scalar_prefetch = 0 : i64, scratch_operands = 0 : i64, tpu.core_type = #tpu.core_type<tc>, window_params = [{transform_indices = @transform_0, window_bounds = array<i64: 16, 8, 128>}, {pipeline_mode = #tpu.pipeline_mode<synchronous>, transform_indices = @transform_1, window_bounds = array<i64: 32, 128>}, {pipeline_mode = #tpu.pipeline_mode<synchronous>, transform_indices = @transform_2, window_bounds = array<i64: 32, 4>}, {pipeline_mode = #tpu.pipeline_mode<synchronous>, transform_indices = @transform_3, window_bounds = array<i64: 1, 4>}, {transform_indices = @transform_4, window_bounds = array<i64: 8, 4>}]} {
    %c0 = arith.constant 0 : index
    %c0_0 = arith.constant 0 : index
    %0 = vector.load %arg2[%c0, %c0_0] : memref<32x128xf32, #tpu.memory_space<vmem>>, vector<32x128xf32>
    %1 = tpu.iota {dimensions = array<i32: 1>} : vector<8x128xi32>
    %c64_i32 = arith.constant 64 : i32
    %2 = vector.broadcast %c64_i32 : i32 to vector<8x128xi32>
    %3 = arith.cmpi sge, %1, %2 : vector<8x128xi32>
    %c96_i32 = arith.constant 96 : i32
    %4 = vector.broadcast %c96_i32 : i32 to vector<8x128xi32>
    %5 = arith.cmpi slt, %1, %4 : vector<8x128xi32>
    %6 = arith.andi %3, %5 : vector<8x128xi1>
    %cst = arith.constant 2.000000e+00 : f32
    %cst_1 = arith.constant 1.000000e+00 : f32
    %7 = vector.broadcast %cst : f32 to vector<8x128xf32>
    %8 = vector.broadcast %cst_1 : f32 to vector<8x128xf32>
    %9 = arith.select %6, %7, %8 : vector<8x128xi1>, vector<8x128xf32>
    %cst_2 = arith.constant 2.000000e+00 : f32
    %cst_3 = arith.constant 1.000000e+00 : f32
    %10 = vector.broadcast %cst_2 : f32 to vector<8x128xf32>
    %11 = vector.broadcast %cst_3 : f32 to vector<8x128xf32>
    %12 = arith.select %6, %10, %11 : vector<8x128xi1>, vector<8x128xf32>
    %cst_4 = arith.constant -1.000000e+00 : f32
    %cst_5 = arith.constant 0.000000e+00 : f32
    %13 = vector.broadcast %cst_4 : f32 to vector<8x128xf32>
    %14 = vector.broadcast %cst_5 : f32 to vector<8x128xf32>
    %15 = arith.select %6, %13, %14 : vector<8x128xi1>, vector<8x128xf32>
    %cst_6 = arith.constant 0.000000e+00 : f32
    %16 = vector.broadcast %cst_6 : f32 to vector<8x32xf32>
    %cst_7 = arith.constant 0.000000e+00 : f32
    %17 = vector.broadcast %cst_7 : f32 to vector<8x32xf32>
    %c0_i32 = arith.constant 0 : i32
    %18 = arith.index_cast %c0_i32 : i32 to index
    %c0_8 = arith.constant 0 : index
    %c0_9 = arith.constant 0 : index
    %19 = vector.load %arg1[%18, %c0_8, %c0_9] : memref<16x8x128xf32, #tpu.memory_space<vmem>>, vector<1x8x128xf32>
    %20 = vector.shape_cast %19 : vector<1x8x128xf32> to vector<8x128xf32>
    %cst_10 = arith.constant dense<0.000000e+00> : vector<8x128xf32>
    %21 = tpu.matmul %16, %0, %cst_10 {dimension_numbers = #tpu.dot_dimension_numbers<[1], [0], [0], [1], [0, 0, 1, 1], [], []>} : vector<8x32xf32>, vector<32x128xf32>, vector<8x128xf32> -> vector<8x128xf32>
    %22 = arith.addf %20, %21 : vector<8x128xf32>
    %23 = arith.mulf %22, %9 : vector<8x128xf32>
    %cst_11 = arith.constant 0.000000e+00 : f32
    %24 = vector.broadcast %cst_11 : f32 to vector<8x128xf32>
    %25 = arith.subf %24, %23 : vector<8x128xf32>
    %26 = math.exp %25 : vector<8x128xf32>
    %cst_12 = arith.constant 1.000000e+00 : f32
    %27 = vector.broadcast %cst_12 : f32 to vector<8x128xf32>
    %28 = arith.addf %27, %26 : vector<8x128xf32>
    %29 = tpu.reciprocal %28 {approx = true} : vector<8x128xf32> -> vector<8x128xf32>
    %30 = arith.mulf %29, %12 : vector<8x128xf32>
    %31 = arith.addf %30, %15 : vector<8x128xf32>
    %32 = vector.extract_strided_slice %31 {offsets = [0, 0], sizes = [8, 32], strides = [1, 1]} : vector<8x128xf32> to vector<8x32xf32>
    %33 = vector.extract_strided_slice %31 {offsets = [0, 32], sizes = [8, 32], strides = [1, 1]} : vector<8x128xf32> to vector<8x32xf32>
    %34 = vector.extract_strided_slice %31 {offsets = [0, 64], sizes = [8, 32], strides = [1, 1]} : vector<8x128xf32> to vector<8x32xf32>
    %35 = vector.extract_strided_slice %31 {offsets = [0, 96], sizes = [8, 32], strides = [1, 1]} : vector<8x128xf32> to vector<8x32xf32>
    %36 = arith.mulf %33, %17 : vector<8x32xf32>
    %37 = arith.mulf %32, %34 : vector<8x32xf32>
    %38 = arith.addf %36, %37 : vector<8x32xf32>
    %39 = math.tanh %38 : vector<8x32xf32>
    %40 = arith.mulf %35, %39 : vector<8x32xf32>
    %c1_i32 = arith.constant 1 : i32
    %41 = arith.index_cast %c1_i32 : i32 to index
    %c0_13 = arith.constant 0 : index
    %c0_14 = arith.constant 0 : index
    %42 = vector.load %arg1[%41, %c0_13, %c0_14] : memref<16x8x128xf32, #tpu.memory_space<vmem>>, vector<1x8x128xf32>
    %43 = vector.shape_cast %42 : vector<1x8x128xf32> to vector<8x128xf32>
    %cst_15 = arith.constant dense<0.000000e+00> : vector<8x128xf32>
    %44 = tpu.matmul %40, %0, %cst_15 {dimension_numbers = #tpu.dot_dimension_numbers<[1], [0], [0], [1], [0, 0, 1, 1], [], []>} : vector<8x32xf32>, vector<32x128xf32>, vector<8x128xf32> -> vector<8x128xf32>
    %45 = arith.addf %43, %44 : vector<8x128xf32>
    %46 = arith.mulf %45, %9 : vector<8x128xf32>
    %cst_16 = arith.constant 0.000000e+00 : f32
    %47 = vector.broadcast %cst_16 : f32 to vector<8x128xf32>
    %48 = arith.subf %47, %46 : vector<8x128xf32>
    %49 = math.exp %48 : vector<8x128xf32>
    %cst_17 = arith.constant 1.000000e+00 : f32
    %50 = vector.broadcast %cst_17 : f32 to vector<8x128xf32>
    %51 = arith.addf %50, %49 : vector<8x128xf32>
    %52 = tpu.reciprocal %51 {approx = true} : vector<8x128xf32> -> vector<8x128xf32>
    %53 = arith.mulf %52, %12 : vector<8x128xf32>
    %54 = arith.addf %53, %15 : vector<8x128xf32>
    %55 = vector.extract_strided_slice %54 {offsets = [0, 0], sizes = [8, 32], strides = [1, 1]} : vector<8x128xf32> to vector<8x32xf32>
    %56 = vector.extract_strided_slice %54 {offsets = [0, 32], sizes = [8, 32], strides = [1, 1]} : vector<8x128xf32> to vector<8x32xf32>
    %57 = vector.extract_strided_slice %54 {offsets = [0, 64], sizes = [8, 32], strides = [1, 1]} : vector<8x128xf32> to vector<8x32xf32>
    %58 = vector.extract_strided_slice %54 {offsets = [0, 96], sizes = [8, 32], strides = [1, 1]} : vector<8x128xf32> to vector<8x32xf32>
    %59 = arith.mulf %56, %38 : vector<8x32xf32>
    %60 = arith.mulf %55, %57 : vector<8x32xf32>
    %61 = arith.addf %59, %60 : vector<8x32xf32>
    %62 = math.tanh %61 : vector<8x32xf32>
    %63 = arith.mulf %58, %62 : vector<8x32xf32>
    %c2_i32 = arith.constant 2 : i32
    %64 = arith.index_cast %c2_i32 : i32 to index
    %c0_18 = arith.constant 0 : index
    %c0_19 = arith.constant 0 : index
    %65 = vector.load %arg1[%64, %c0_18, %c0_19] : memref<16x8x128xf32, #tpu.memory_space<vmem>>, vector<1x8x128xf32>
    %66 = vector.shape_cast %65 : vector<1x8x128xf32> to vector<8x128xf32>
    %cst_20 = arith.constant dense<0.000000e+00> : vector<8x128xf32>
    %67 = tpu.matmul %63, %0, %cst_20 {dimension_numbers = #tpu.dot_dimension_numbers<[1], [0], [0], [1], [0, 0, 1, 1], [], []>} : vector<8x32xf32>, vector<32x128xf32>, vector<8x128xf32> -> vector<8x128xf32>
    %68 = arith.addf %66, %67 : vector<8x128xf32>
    %69 = arith.mulf %68, %9 : vector<8x128xf32>
    %cst_21 = arith.constant 0.000000e+00 : f32
    %70 = vector.broadcast %cst_21 : f32 to vector<8x128xf32>
    %71 = arith.subf %70, %69 : vector<8x128xf32>
    %72 = math.exp %71 : vector<8x128xf32>
    %cst_22 = arith.constant 1.000000e+00 : f32
    %73 = vector.broadcast %cst_22 : f32 to vector<8x128xf32>
    %74 = arith.addf %73, %72 : vector<8x128xf32>
    %75 = tpu.reciprocal %74 {approx = true} : vector<8x128xf32> -> vector<8x128xf32>
    %76 = arith.mulf %75, %12 : vector<8x128xf32>
    %77 = arith.addf %76, %15 : vector<8x128xf32>
    %78 = vector.extract_strided_slice %77 {offsets = [0, 0], sizes = [8, 32], strides = [1, 1]} : vector<8x128xf32> to vector<8x32xf32>
    %79 = vector.extract_strided_slice %77 {offsets = [0, 32], sizes = [8, 32], strides = [1, 1]} : vector<8x128xf32> to vector<8x32xf32>
    %80 = vector.extract_strided_slice %77 {offsets = [0, 64], sizes = [8, 32], strides = [1, 1]} : vector<8x128xf32> to vector<8x32xf32>
    %81 = vector.extract_strided_slice %77 {offsets = [0, 96], sizes = [8, 32], strides = [1, 1]} : vector<8x128xf32> to vector<8x32xf32>
    %82 = arith.mulf %79, %61 : vector<8x32xf32>
    %83 = arith.mulf %78, %80 : vector<8x32xf32>
    %84 = arith.addf %82, %83 : vector<8x32xf32>
    %85 = math.tanh %84 : vector<8x32xf32>
    %86 = arith.mulf %81, %85 : vector<8x32xf32>
    %c3_i32 = arith.constant 3 : i32
    %87 = arith.index_cast %c3_i32 : i32 to index
    %c0_23 = arith.constant 0 : index
    %c0_24 = arith.constant 0 : index
    %88 = vector.load %arg1[%87, %c0_23, %c0_24] : memref<16x8x128xf32, #tpu.memory_space<vmem>>, vector<1x8x128xf32>
    %89 = vector.shape_cast %88 : vector<1x8x128xf32> to vector<8x128xf32>
    %cst_25 = arith.constant dense<0.000000e+00> : vector<8x128xf32>
    %90 = tpu.matmul %86, %0, %cst_25 {dimension_numbers = #tpu.dot_dimension_numbers<[1], [0], [0], [1], [0, 0, 1, 1], [], []>} : vector<8x32xf32>, vector<32x128xf32>, vector<8x128xf32> -> vector<8x128xf32>
    %91 = arith.addf %89, %90 : vector<8x128xf32>
    %92 = arith.mulf %91, %9 : vector<8x128xf32>
    %cst_26 = arith.constant 0.000000e+00 : f32
    %93 = vector.broadcast %cst_26 : f32 to vector<8x128xf32>
    %94 = arith.subf %93, %92 : vector<8x128xf32>
    %95 = math.exp %94 : vector<8x128xf32>
    %cst_27 = arith.constant 1.000000e+00 : f32
    %96 = vector.broadcast %cst_27 : f32 to vector<8x128xf32>
    %97 = arith.addf %96, %95 : vector<8x128xf32>
    %98 = tpu.reciprocal %97 {approx = true} : vector<8x128xf32> -> vector<8x128xf32>
    %99 = arith.mulf %98, %12 : vector<8x128xf32>
    %100 = arith.addf %99, %15 : vector<8x128xf32>
    %101 = vector.extract_strided_slice %100 {offsets = [0, 0], sizes = [8, 32], strides = [1, 1]} : vector<8x128xf32> to vector<8x32xf32>
    %102 = vector.extract_strided_slice %100 {offsets = [0, 32], sizes = [8, 32], strides = [1, 1]} : vector<8x128xf32> to vector<8x32xf32>
    %103 = vector.extract_strided_slice %100 {offsets = [0, 64], sizes = [8, 32], strides = [1, 1]} : vector<8x128xf32> to vector<8x32xf32>
    %104 = vector.extract_strided_slice %100 {offsets = [0, 96], sizes = [8, 32], strides = [1, 1]} : vector<8x128xf32> to vector<8x32xf32>
    %105 = arith.mulf %102, %84 : vector<8x32xf32>
    %106 = arith.mulf %101, %103 : vector<8x32xf32>
    %107 = arith.addf %105, %106 : vector<8x32xf32>
    %108 = math.tanh %107 : vector<8x32xf32>
    %109 = arith.mulf %104, %108 : vector<8x32xf32>
    %c4_i32 = arith.constant 4 : i32
    %110 = arith.index_cast %c4_i32 : i32 to index
    %c0_28 = arith.constant 0 : index
    %c0_29 = arith.constant 0 : index
    %111 = vector.load %arg1[%110, %c0_28, %c0_29] : memref<16x8x128xf32, #tpu.memory_space<vmem>>, vector<1x8x128xf32>
    %112 = vector.shape_cast %111 : vector<1x8x128xf32> to vector<8x128xf32>
    %cst_30 = arith.constant dense<0.000000e+00> : vector<8x128xf32>
    %113 = tpu.matmul %109, %0, %cst_30 {dimension_numbers = #tpu.dot_dimension_numbers<[1], [0], [0], [1], [0, 0, 1, 1], [], []>} : vector<8x32xf32>, vector<32x128xf32>, vector<8x128xf32> -> vector<8x128xf32>
    %114 = arith.addf %112, %113 : vector<8x128xf32>
    %115 = arith.mulf %114, %9 : vector<8x128xf32>
    %cst_31 = arith.constant 0.000000e+00 : f32
    %116 = vector.broadcast %cst_31 : f32 to vector<8x128xf32>
    %117 = arith.subf %116, %115 : vector<8x128xf32>
    %118 = math.exp %117 : vector<8x128xf32>
    %cst_32 = arith.constant 1.000000e+00 : f32
    %119 = vector.broadcast %cst_32 : f32 to vector<8x128xf32>
    %120 = arith.addf %119, %118 : vector<8x128xf32>
    %121 = tpu.reciprocal %120 {approx = true} : vector<8x128xf32> -> vector<8x128xf32>
    %122 = arith.mulf %121, %12 : vector<8x128xf32>
    %123 = arith.addf %122, %15 : vector<8x128xf32>
    %124 = vector.extract_strided_slice %123 {offsets = [0, 0], sizes = [8, 32], strides = [1, 1]} : vector<8x128xf32> to vector<8x32xf32>
    %125 = vector.extract_strided_slice %123 {offsets = [0, 32], sizes = [8, 32], strides = [1, 1]} : vector<8x128xf32> to vector<8x32xf32>
    %126 = vector.extract_strided_slice %123 {offsets = [0, 64], sizes = [8, 32], strides = [1, 1]} : vector<8x128xf32> to vector<8x32xf32>
    %127 = vector.extract_strided_slice %123 {offsets = [0, 96], sizes = [8, 32], strides = [1, 1]} : vector<8x128xf32> to vector<8x32xf32>
    %128 = arith.mulf %125, %107 : vector<8x32xf32>
    %129 = arith.mulf %124, %126 : vector<8x32xf32>
    %130 = arith.addf %128, %129 : vector<8x32xf32>
    %131 = math.tanh %130 : vector<8x32xf32>
    %132 = arith.mulf %127, %131 : vector<8x32xf32>
    %c5_i32 = arith.constant 5 : i32
    %133 = arith.index_cast %c5_i32 : i32 to index
    %c0_33 = arith.constant 0 : index
    %c0_34 = arith.constant 0 : index
    %134 = vector.load %arg1[%133, %c0_33, %c0_34] : memref<16x8x128xf32, #tpu.memory_space<vmem>>, vector<1x8x128xf32>
    %135 = vector.shape_cast %134 : vector<1x8x128xf32> to vector<8x128xf32>
    %cst_35 = arith.constant dense<0.000000e+00> : vector<8x128xf32>
    %136 = tpu.matmul %132, %0, %cst_35 {dimension_numbers = #tpu.dot_dimension_numbers<[1], [0], [0], [1], [0, 0, 1, 1], [], []>} : vector<8x32xf32>, vector<32x128xf32>, vector<8x128xf32> -> vector<8x128xf32>
    %137 = arith.addf %135, %136 : vector<8x128xf32>
    %138 = arith.mulf %137, %9 : vector<8x128xf32>
    %cst_36 = arith.constant 0.000000e+00 : f32
    %139 = vector.broadcast %cst_36 : f32 to vector<8x128xf32>
    %140 = arith.subf %139, %138 : vector<8x128xf32>
    %141 = math.exp %140 : vector<8x128xf32>
    %cst_37 = arith.constant 1.000000e+00 : f32
    %142 = vector.broadcast %cst_37 : f32 to vector<8x128xf32>
    %143 = arith.addf %142, %141 : vector<8x128xf32>
    %144 = tpu.reciprocal %143 {approx = true} : vector<8x128xf32> -> vector<8x128xf32>
    %145 = arith.mulf %144, %12 : vector<8x128xf32>
    %146 = arith.addf %145, %15 : vector<8x128xf32>
    %147 = vector.extract_strided_slice %146 {offsets = [0, 0], sizes = [8, 32], strides = [1, 1]} : vector<8x128xf32> to vector<8x32xf32>
    %148 = vector.extract_strided_slice %146 {offsets = [0, 32], sizes = [8, 32], strides = [1, 1]} : vector<8x128xf32> to vector<8x32xf32>
    %149 = vector.extract_strided_slice %146 {offsets = [0, 64], sizes = [8, 32], strides = [1, 1]} : vector<8x128xf32> to vector<8x32xf32>
    %150 = vector.extract_strided_slice %146 {offsets = [0, 96], sizes = [8, 32], strides = [1, 1]} : vector<8x128xf32> to vector<8x32xf32>
    %151 = arith.mulf %148, %130 : vector<8x32xf32>
    %152 = arith.mulf %147, %149 : vector<8x32xf32>
    %153 = arith.addf %151, %152 : vector<8x32xf32>
    %154 = math.tanh %153 : vector<8x32xf32>
    %155 = arith.mulf %150, %154 : vector<8x32xf32>
    %c6_i32 = arith.constant 6 : i32
    %156 = arith.index_cast %c6_i32 : i32 to index
    %c0_38 = arith.constant 0 : index
    %c0_39 = arith.constant 0 : index
    %157 = vector.load %arg1[%156, %c0_38, %c0_39] : memref<16x8x128xf32, #tpu.memory_space<vmem>>, vector<1x8x128xf32>
    %158 = vector.shape_cast %157 : vector<1x8x128xf32> to vector<8x128xf32>
    %cst_40 = arith.constant dense<0.000000e+00> : vector<8x128xf32>
    %159 = tpu.matmul %155, %0, %cst_40 {dimension_numbers = #tpu.dot_dimension_numbers<[1], [0], [0], [1], [0, 0, 1, 1], [], []>} : vector<8x32xf32>, vector<32x128xf32>, vector<8x128xf32> -> vector<8x128xf32>
    %160 = arith.addf %158, %159 : vector<8x128xf32>
    %161 = arith.mulf %160, %9 : vector<8x128xf32>
    %cst_41 = arith.constant 0.000000e+00 : f32
    %162 = vector.broadcast %cst_41 : f32 to vector<8x128xf32>
    %163 = arith.subf %162, %161 : vector<8x128xf32>
    %164 = math.exp %163 : vector<8x128xf32>
    %cst_42 = arith.constant 1.000000e+00 : f32
    %165 = vector.broadcast %cst_42 : f32 to vector<8x128xf32>
    %166 = arith.addf %165, %164 : vector<8x128xf32>
    %167 = tpu.reciprocal %166 {approx = true} : vector<8x128xf32> -> vector<8x128xf32>
    %168 = arith.mulf %167, %12 : vector<8x128xf32>
    %169 = arith.addf %168, %15 : vector<8x128xf32>
    %170 = vector.extract_strided_slice %169 {offsets = [0, 0], sizes = [8, 32], strides = [1, 1]} : vector<8x128xf32> to vector<8x32xf32>
    %171 = vector.extract_strided_slice %169 {offsets = [0, 32], sizes = [8, 32], strides = [1, 1]} : vector<8x128xf32> to vector<8x32xf32>
    %172 = vector.extract_strided_slice %169 {offsets = [0, 64], sizes = [8, 32], strides = [1, 1]} : vector<8x128xf32> to vector<8x32xf32>
    %173 = vector.extract_strided_slice %169 {offsets = [0, 96], sizes = [8, 32], strides = [1, 1]} : vector<8x128xf32> to vector<8x32xf32>
    %174 = arith.mulf %171, %153 : vector<8x32xf32>
    %175 = arith.mulf %170, %172 : vector<8x32xf32>
    %176 = arith.addf %174, %175 : vector<8x32xf32>
    %177 = math.tanh %176 : vector<8x32xf32>
    %178 = arith.mulf %173, %177 : vector<8x32xf32>
    %c7_i32 = arith.constant 7 : i32
    %179 = arith.index_cast %c7_i32 : i32 to index
    %c0_43 = arith.constant 0 : index
    %c0_44 = arith.constant 0 : index
    %180 = vector.load %arg1[%179, %c0_43, %c0_44] : memref<16x8x128xf32, #tpu.memory_space<vmem>>, vector<1x8x128xf32>
    %181 = vector.shape_cast %180 : vector<1x8x128xf32> to vector<8x128xf32>
    %cst_45 = arith.constant dense<0.000000e+00> : vector<8x128xf32>
    %182 = tpu.matmul %178, %0, %cst_45 {dimension_numbers = #tpu.dot_dimension_numbers<[1], [0], [0], [1], [0, 0, 1, 1], [], []>} : vector<8x32xf32>, vector<32x128xf32>, vector<8x128xf32> -> vector<8x128xf32>
    %183 = arith.addf %181, %182 : vector<8x128xf32>
    %184 = arith.mulf %183, %9 : vector<8x128xf32>
    %cst_46 = arith.constant 0.000000e+00 : f32
    %185 = vector.broadcast %cst_46 : f32 to vector<8x128xf32>
    %186 = arith.subf %185, %184 : vector<8x128xf32>
    %187 = math.exp %186 : vector<8x128xf32>
    %cst_47 = arith.constant 1.000000e+00 : f32
    %188 = vector.broadcast %cst_47 : f32 to vector<8x128xf32>
    %189 = arith.addf %188, %187 : vector<8x128xf32>
    %190 = tpu.reciprocal %189 {approx = true} : vector<8x128xf32> -> vector<8x128xf32>
    %191 = arith.mulf %190, %12 : vector<8x128xf32>
    %192 = arith.addf %191, %15 : vector<8x128xf32>
    %193 = vector.extract_strided_slice %192 {offsets = [0, 0], sizes = [8, 32], strides = [1, 1]} : vector<8x128xf32> to vector<8x32xf32>
    %194 = vector.extract_strided_slice %192 {offsets = [0, 32], sizes = [8, 32], strides = [1, 1]} : vector<8x128xf32> to vector<8x32xf32>
    %195 = vector.extract_strided_slice %192 {offsets = [0, 64], sizes = [8, 32], strides = [1, 1]} : vector<8x128xf32> to vector<8x32xf32>
    %196 = vector.extract_strided_slice %192 {offsets = [0, 96], sizes = [8, 32], strides = [1, 1]} : vector<8x128xf32> to vector<8x32xf32>
    %197 = arith.mulf %194, %176 : vector<8x32xf32>
    %198 = arith.mulf %193, %195 : vector<8x32xf32>
    %199 = arith.addf %197, %198 : vector<8x32xf32>
    %200 = math.tanh %199 : vector<8x32xf32>
    %201 = arith.mulf %196, %200 : vector<8x32xf32>
    %c8_i32 = arith.constant 8 : i32
    %202 = arith.index_cast %c8_i32 : i32 to index
    %c0_48 = arith.constant 0 : index
    %c0_49 = arith.constant 0 : index
    %203 = vector.load %arg1[%202, %c0_48, %c0_49] : memref<16x8x128xf32, #tpu.memory_space<vmem>>, vector<1x8x128xf32>
    %204 = vector.shape_cast %203 : vector<1x8x128xf32> to vector<8x128xf32>
    %cst_50 = arith.constant dense<0.000000e+00> : vector<8x128xf32>
    %205 = tpu.matmul %201, %0, %cst_50 {dimension_numbers = #tpu.dot_dimension_numbers<[1], [0], [0], [1], [0, 0, 1, 1], [], []>} : vector<8x32xf32>, vector<32x128xf32>, vector<8x128xf32> -> vector<8x128xf32>
    %206 = arith.addf %204, %205 : vector<8x128xf32>
    %207 = arith.mulf %206, %9 : vector<8x128xf32>
    %cst_51 = arith.constant 0.000000e+00 : f32
    %208 = vector.broadcast %cst_51 : f32 to vector<8x128xf32>
    %209 = arith.subf %208, %207 : vector<8x128xf32>
    %210 = math.exp %209 : vector<8x128xf32>
    %cst_52 = arith.constant 1.000000e+00 : f32
    %211 = vector.broadcast %cst_52 : f32 to vector<8x128xf32>
    %212 = arith.addf %211, %210 : vector<8x128xf32>
    %213 = tpu.reciprocal %212 {approx = true} : vector<8x128xf32> -> vector<8x128xf32>
    %214 = arith.mulf %213, %12 : vector<8x128xf32>
    %215 = arith.addf %214, %15 : vector<8x128xf32>
    %216 = vector.extract_strided_slice %215 {offsets = [0, 0], sizes = [8, 32], strides = [1, 1]} : vector<8x128xf32> to vector<8x32xf32>
    %217 = vector.extract_strided_slice %215 {offsets = [0, 32], sizes = [8, 32], strides = [1, 1]} : vector<8x128xf32> to vector<8x32xf32>
    %218 = vector.extract_strided_slice %215 {offsets = [0, 64], sizes = [8, 32], strides = [1, 1]} : vector<8x128xf32> to vector<8x32xf32>
    %219 = vector.extract_strided_slice %215 {offsets = [0, 96], sizes = [8, 32], strides = [1, 1]} : vector<8x128xf32> to vector<8x32xf32>
    %220 = arith.mulf %217, %199 : vector<8x32xf32>
    %221 = arith.mulf %216, %218 : vector<8x32xf32>
    %222 = arith.addf %220, %221 : vector<8x32xf32>
    %223 = math.tanh %222 : vector<8x32xf32>
    %224 = arith.mulf %219, %223 : vector<8x32xf32>
    %c9_i32 = arith.constant 9 : i32
    %225 = arith.index_cast %c9_i32 : i32 to index
    %c0_53 = arith.constant 0 : index
    %c0_54 = arith.constant 0 : index
    %226 = vector.load %arg1[%225, %c0_53, %c0_54] : memref<16x8x128xf32, #tpu.memory_space<vmem>>, vector<1x8x128xf32>
    %227 = vector.shape_cast %226 : vector<1x8x128xf32> to vector<8x128xf32>
    %cst_55 = arith.constant dense<0.000000e+00> : vector<8x128xf32>
    %228 = tpu.matmul %224, %0, %cst_55 {dimension_numbers = #tpu.dot_dimension_numbers<[1], [0], [0], [1], [0, 0, 1, 1], [], []>} : vector<8x32xf32>, vector<32x128xf32>, vector<8x128xf32> -> vector<8x128xf32>
    %229 = arith.addf %227, %228 : vector<8x128xf32>
    %230 = arith.mulf %229, %9 : vector<8x128xf32>
    %cst_56 = arith.constant 0.000000e+00 : f32
    %231 = vector.broadcast %cst_56 : f32 to vector<8x128xf32>
    %232 = arith.subf %231, %230 : vector<8x128xf32>
    %233 = math.exp %232 : vector<8x128xf32>
    %cst_57 = arith.constant 1.000000e+00 : f32
    %234 = vector.broadcast %cst_57 : f32 to vector<8x128xf32>
    %235 = arith.addf %234, %233 : vector<8x128xf32>
    %236 = tpu.reciprocal %235 {approx = true} : vector<8x128xf32> -> vector<8x128xf32>
    %237 = arith.mulf %236, %12 : vector<8x128xf32>
    %238 = arith.addf %237, %15 : vector<8x128xf32>
    %239 = vector.extract_strided_slice %238 {offsets = [0, 0], sizes = [8, 32], strides = [1, 1]} : vector<8x128xf32> to vector<8x32xf32>
    %240 = vector.extract_strided_slice %238 {offsets = [0, 32], sizes = [8, 32], strides = [1, 1]} : vector<8x128xf32> to vector<8x32xf32>
    %241 = vector.extract_strided_slice %238 {offsets = [0, 64], sizes = [8, 32], strides = [1, 1]} : vector<8x128xf32> to vector<8x32xf32>
    %242 = vector.extract_strided_slice %238 {offsets = [0, 96], sizes = [8, 32], strides = [1, 1]} : vector<8x128xf32> to vector<8x32xf32>
    %243 = arith.mulf %240, %222 : vector<8x32xf32>
    %244 = arith.mulf %239, %241 : vector<8x32xf32>
    %245 = arith.addf %243, %244 : vector<8x32xf32>
    %246 = math.tanh %245 : vector<8x32xf32>
    %247 = arith.mulf %242, %246 : vector<8x32xf32>
    %c10_i32 = arith.constant 10 : i32
    %248 = arith.index_cast %c10_i32 : i32 to index
    %c0_58 = arith.constant 0 : index
    %c0_59 = arith.constant 0 : index
    %249 = vector.load %arg1[%248, %c0_58, %c0_59] : memref<16x8x128xf32, #tpu.memory_space<vmem>>, vector<1x8x128xf32>
    %250 = vector.shape_cast %249 : vector<1x8x128xf32> to vector<8x128xf32>
    %cst_60 = arith.constant dense<0.000000e+00> : vector<8x128xf32>
    %251 = tpu.matmul %247, %0, %cst_60 {dimension_numbers = #tpu.dot_dimension_numbers<[1], [0], [0], [1], [0, 0, 1, 1], [], []>} : vector<8x32xf32>, vector<32x128xf32>, vector<8x128xf32> -> vector<8x128xf32>
    %252 = arith.addf %250, %251 : vector<8x128xf32>
    %253 = arith.mulf %252, %9 : vector<8x128xf32>
    %cst_61 = arith.constant 0.000000e+00 : f32
    %254 = vector.broadcast %cst_61 : f32 to vector<8x128xf32>
    %255 = arith.subf %254, %253 : vector<8x128xf32>
    %256 = math.exp %255 : vector<8x128xf32>
    %cst_62 = arith.constant 1.000000e+00 : f32
    %257 = vector.broadcast %cst_62 : f32 to vector<8x128xf32>
    %258 = arith.addf %257, %256 : vector<8x128xf32>
    %259 = tpu.reciprocal %258 {approx = true} : vector<8x128xf32> -> vector<8x128xf32>
    %260 = arith.mulf %259, %12 : vector<8x128xf32>
    %261 = arith.addf %260, %15 : vector<8x128xf32>
    %262 = vector.extract_strided_slice %261 {offsets = [0, 0], sizes = [8, 32], strides = [1, 1]} : vector<8x128xf32> to vector<8x32xf32>
    %263 = vector.extract_strided_slice %261 {offsets = [0, 32], sizes = [8, 32], strides = [1, 1]} : vector<8x128xf32> to vector<8x32xf32>
    %264 = vector.extract_strided_slice %261 {offsets = [0, 64], sizes = [8, 32], strides = [1, 1]} : vector<8x128xf32> to vector<8x32xf32>
    %265 = vector.extract_strided_slice %261 {offsets = [0, 96], sizes = [8, 32], strides = [1, 1]} : vector<8x128xf32> to vector<8x32xf32>
    %266 = arith.mulf %263, %245 : vector<8x32xf32>
    %267 = arith.mulf %262, %264 : vector<8x32xf32>
    %268 = arith.addf %266, %267 : vector<8x32xf32>
    %269 = math.tanh %268 : vector<8x32xf32>
    %270 = arith.mulf %265, %269 : vector<8x32xf32>
    %c11_i32 = arith.constant 11 : i32
    %271 = arith.index_cast %c11_i32 : i32 to index
    %c0_63 = arith.constant 0 : index
    %c0_64 = arith.constant 0 : index
    %272 = vector.load %arg1[%271, %c0_63, %c0_64] : memref<16x8x128xf32, #tpu.memory_space<vmem>>, vector<1x8x128xf32>
    %273 = vector.shape_cast %272 : vector<1x8x128xf32> to vector<8x128xf32>
    %cst_65 = arith.constant dense<0.000000e+00> : vector<8x128xf32>
    %274 = tpu.matmul %270, %0, %cst_65 {dimension_numbers = #tpu.dot_dimension_numbers<[1], [0], [0], [1], [0, 0, 1, 1], [], []>} : vector<8x32xf32>, vector<32x128xf32>, vector<8x128xf32> -> vector<8x128xf32>
    %275 = arith.addf %273, %274 : vector<8x128xf32>
    %276 = arith.mulf %275, %9 : vector<8x128xf32>
    %cst_66 = arith.constant 0.000000e+00 : f32
    %277 = vector.broadcast %cst_66 : f32 to vector<8x128xf32>
    %278 = arith.subf %277, %276 : vector<8x128xf32>
    %279 = math.exp %278 : vector<8x128xf32>
    %cst_67 = arith.constant 1.000000e+00 : f32
    %280 = vector.broadcast %cst_67 : f32 to vector<8x128xf32>
    %281 = arith.addf %280, %279 : vector<8x128xf32>
    %282 = tpu.reciprocal %281 {approx = true} : vector<8x128xf32> -> vector<8x128xf32>
    %283 = arith.mulf %282, %12 : vector<8x128xf32>
    %284 = arith.addf %283, %15 : vector<8x128xf32>
    %285 = vector.extract_strided_slice %284 {offsets = [0, 0], sizes = [8, 32], strides = [1, 1]} : vector<8x128xf32> to vector<8x32xf32>
    %286 = vector.extract_strided_slice %284 {offsets = [0, 32], sizes = [8, 32], strides = [1, 1]} : vector<8x128xf32> to vector<8x32xf32>
    %287 = vector.extract_strided_slice %284 {offsets = [0, 64], sizes = [8, 32], strides = [1, 1]} : vector<8x128xf32> to vector<8x32xf32>
    %288 = vector.extract_strided_slice %284 {offsets = [0, 96], sizes = [8, 32], strides = [1, 1]} : vector<8x128xf32> to vector<8x32xf32>
    %289 = arith.mulf %286, %268 : vector<8x32xf32>
    %290 = arith.mulf %285, %287 : vector<8x32xf32>
    %291 = arith.addf %289, %290 : vector<8x32xf32>
    %292 = math.tanh %291 : vector<8x32xf32>
    %293 = arith.mulf %288, %292 : vector<8x32xf32>
    %c12_i32 = arith.constant 12 : i32
    %294 = arith.index_cast %c12_i32 : i32 to index
    %c0_68 = arith.constant 0 : index
    %c0_69 = arith.constant 0 : index
    %295 = vector.load %arg1[%294, %c0_68, %c0_69] : memref<16x8x128xf32, #tpu.memory_space<vmem>>, vector<1x8x128xf32>
    %296 = vector.shape_cast %295 : vector<1x8x128xf32> to vector<8x128xf32>
    %cst_70 = arith.constant dense<0.000000e+00> : vector<8x128xf32>
    %297 = tpu.matmul %293, %0, %cst_70 {dimension_numbers = #tpu.dot_dimension_numbers<[1], [0], [0], [1], [0, 0, 1, 1], [], []>} : vector<8x32xf32>, vector<32x128xf32>, vector<8x128xf32> -> vector<8x128xf32>
    %298 = arith.addf %296, %297 : vector<8x128xf32>
    %299 = arith.mulf %298, %9 : vector<8x128xf32>
    %cst_71 = arith.constant 0.000000e+00 : f32
    %300 = vector.broadcast %cst_71 : f32 to vector<8x128xf32>
    %301 = arith.subf %300, %299 : vector<8x128xf32>
    %302 = math.exp %301 : vector<8x128xf32>
    %cst_72 = arith.constant 1.000000e+00 : f32
    %303 = vector.broadcast %cst_72 : f32 to vector<8x128xf32>
    %304 = arith.addf %303, %302 : vector<8x128xf32>
    %305 = tpu.reciprocal %304 {approx = true} : vector<8x128xf32> -> vector<8x128xf32>
    %306 = arith.mulf %305, %12 : vector<8x128xf32>
    %307 = arith.addf %306, %15 : vector<8x128xf32>
    %308 = vector.extract_strided_slice %307 {offsets = [0, 0], sizes = [8, 32], strides = [1, 1]} : vector<8x128xf32> to vector<8x32xf32>
    %309 = vector.extract_strided_slice %307 {offsets = [0, 32], sizes = [8, 32], strides = [1, 1]} : vector<8x128xf32> to vector<8x32xf32>
    %310 = vector.extract_strided_slice %307 {offsets = [0, 64], sizes = [8, 32], strides = [1, 1]} : vector<8x128xf32> to vector<8x32xf32>
    %311 = vector.extract_strided_slice %307 {offsets = [0, 96], sizes = [8, 32], strides = [1, 1]} : vector<8x128xf32> to vector<8x32xf32>
    %312 = arith.mulf %309, %291 : vector<8x32xf32>
    %313 = arith.mulf %308, %310 : vector<8x32xf32>
    %314 = arith.addf %312, %313 : vector<8x32xf32>
    %315 = math.tanh %314 : vector<8x32xf32>
    %316 = arith.mulf %311, %315 : vector<8x32xf32>
    %c13_i32 = arith.constant 13 : i32
    %317 = arith.index_cast %c13_i32 : i32 to index
    %c0_73 = arith.constant 0 : index
    %c0_74 = arith.constant 0 : index
    %318 = vector.load %arg1[%317, %c0_73, %c0_74] : memref<16x8x128xf32, #tpu.memory_space<vmem>>, vector<1x8x128xf32>
    %319 = vector.shape_cast %318 : vector<1x8x128xf32> to vector<8x128xf32>
    %cst_75 = arith.constant dense<0.000000e+00> : vector<8x128xf32>
    %320 = tpu.matmul %316, %0, %cst_75 {dimension_numbers = #tpu.dot_dimension_numbers<[1], [0], [0], [1], [0, 0, 1, 1], [], []>} : vector<8x32xf32>, vector<32x128xf32>, vector<8x128xf32> -> vector<8x128xf32>
    %321 = arith.addf %319, %320 : vector<8x128xf32>
    %322 = arith.mulf %321, %9 : vector<8x128xf32>
    %cst_76 = arith.constant 0.000000e+00 : f32
    %323 = vector.broadcast %cst_76 : f32 to vector<8x128xf32>
    %324 = arith.subf %323, %322 : vector<8x128xf32>
    %325 = math.exp %324 : vector<8x128xf32>
    %cst_77 = arith.constant 1.000000e+00 : f32
    %326 = vector.broadcast %cst_77 : f32 to vector<8x128xf32>
    %327 = arith.addf %326, %325 : vector<8x128xf32>
    %328 = tpu.reciprocal %327 {approx = true} : vector<8x128xf32> -> vector<8x128xf32>
    %329 = arith.mulf %328, %12 : vector<8x128xf32>
    %330 = arith.addf %329, %15 : vector<8x128xf32>
    %331 = vector.extract_strided_slice %330 {offsets = [0, 0], sizes = [8, 32], strides = [1, 1]} : vector<8x128xf32> to vector<8x32xf32>
    %332 = vector.extract_strided_slice %330 {offsets = [0, 32], sizes = [8, 32], strides = [1, 1]} : vector<8x128xf32> to vector<8x32xf32>
    %333 = vector.extract_strided_slice %330 {offsets = [0, 64], sizes = [8, 32], strides = [1, 1]} : vector<8x128xf32> to vector<8x32xf32>
    %334 = vector.extract_strided_slice %330 {offsets = [0, 96], sizes = [8, 32], strides = [1, 1]} : vector<8x128xf32> to vector<8x32xf32>
    %335 = arith.mulf %332, %314 : vector<8x32xf32>
    %336 = arith.mulf %331, %333 : vector<8x32xf32>
    %337 = arith.addf %335, %336 : vector<8x32xf32>
    %338 = math.tanh %337 : vector<8x32xf32>
    %339 = arith.mulf %334, %338 : vector<8x32xf32>
    %c14_i32 = arith.constant 14 : i32
    %340 = arith.index_cast %c14_i32 : i32 to index
    %c0_78 = arith.constant 0 : index
    %c0_79 = arith.constant 0 : index
    %341 = vector.load %arg1[%340, %c0_78, %c0_79] : memref<16x8x128xf32, #tpu.memory_space<vmem>>, vector<1x8x128xf32>
    %342 = vector.shape_cast %341 : vector<1x8x128xf32> to vector<8x128xf32>
    %cst_80 = arith.constant dense<0.000000e+00> : vector<8x128xf32>
    %343 = tpu.matmul %339, %0, %cst_80 {dimension_numbers = #tpu.dot_dimension_numbers<[1], [0], [0], [1], [0, 0, 1, 1], [], []>} : vector<8x32xf32>, vector<32x128xf32>, vector<8x128xf32> -> vector<8x128xf32>
    %344 = arith.addf %342, %343 : vector<8x128xf32>
    %345 = arith.mulf %344, %9 : vector<8x128xf32>
    %cst_81 = arith.constant 0.000000e+00 : f32
    %346 = vector.broadcast %cst_81 : f32 to vector<8x128xf32>
    %347 = arith.subf %346, %345 : vector<8x128xf32>
    %348 = math.exp %347 : vector<8x128xf32>
    %cst_82 = arith.constant 1.000000e+00 : f32
    %349 = vector.broadcast %cst_82 : f32 to vector<8x128xf32>
    %350 = arith.addf %349, %348 : vector<8x128xf32>
    %351 = tpu.reciprocal %350 {approx = true} : vector<8x128xf32> -> vector<8x128xf32>
    %352 = arith.mulf %351, %12 : vector<8x128xf32>
    %353 = arith.addf %352, %15 : vector<8x128xf32>
    %354 = vector.extract_strided_slice %353 {offsets = [0, 0], sizes = [8, 32], strides = [1, 1]} : vector<8x128xf32> to vector<8x32xf32>
    %355 = vector.extract_strided_slice %353 {offsets = [0, 32], sizes = [8, 32], strides = [1, 1]} : vector<8x128xf32> to vector<8x32xf32>
    %356 = vector.extract_strided_slice %353 {offsets = [0, 64], sizes = [8, 32], strides = [1, 1]} : vector<8x128xf32> to vector<8x32xf32>
    %357 = vector.extract_strided_slice %353 {offsets = [0, 96], sizes = [8, 32], strides = [1, 1]} : vector<8x128xf32> to vector<8x32xf32>
    %358 = arith.mulf %355, %337 : vector<8x32xf32>
    %359 = arith.mulf %354, %356 : vector<8x32xf32>
    %360 = arith.addf %358, %359 : vector<8x32xf32>
    %361 = math.tanh %360 : vector<8x32xf32>
    %362 = arith.mulf %357, %361 : vector<8x32xf32>
    %c15_i32 = arith.constant 15 : i32
    %363 = arith.index_cast %c15_i32 : i32 to index
    %c0_83 = arith.constant 0 : index
    %c0_84 = arith.constant 0 : index
    %364 = vector.load %arg1[%363, %c0_83, %c0_84] : memref<16x8x128xf32, #tpu.memory_space<vmem>>, vector<1x8x128xf32>
    %365 = vector.shape_cast %364 : vector<1x8x128xf32> to vector<8x128xf32>
    %cst_85 = arith.constant dense<0.000000e+00> : vector<8x128xf32>
    %366 = tpu.matmul %362, %0, %cst_85 {dimension_numbers = #tpu.dot_dimension_numbers<[1], [0], [0], [1], [0, 0, 1, 1], [], []>} : vector<8x32xf32>, vector<32x128xf32>, vector<8x128xf32> -> vector<8x128xf32>
    %367 = arith.addf %365, %366 : vector<8x128xf32>
    %368 = arith.mulf %367, %9 : vector<8x128xf32>
    %cst_86 = arith.constant 0.000000e+00 : f32
    %369 = vector.broadcast %cst_86 : f32 to vector<8x128xf32>
    %370 = arith.subf %369, %368 : vector<8x128xf32>
    %371 = math.exp %370 : vector<8x128xf32>
    %cst_87 = arith.constant 1.000000e+00 : f32
    %372 = vector.broadcast %cst_87 : f32 to vector<8x128xf32>
    %373 = arith.addf %372, %371 : vector<8x128xf32>
    %374 = tpu.reciprocal %373 {approx = true} : vector<8x128xf32> -> vector<8x128xf32>
    %375 = arith.mulf %374, %12 : vector<8x128xf32>
    %376 = arith.addf %375, %15 : vector<8x128xf32>
    %377 = vector.extract_strided_slice %376 {offsets = [0, 0], sizes = [8, 32], strides = [1, 1]} : vector<8x128xf32> to vector<8x32xf32>
    %378 = vector.extract_strided_slice %376 {offsets = [0, 32], sizes = [8, 32], strides = [1, 1]} : vector<8x128xf32> to vector<8x32xf32>
    %379 = vector.extract_strided_slice %376 {offsets = [0, 64], sizes = [8, 32], strides = [1, 1]} : vector<8x128xf32> to vector<8x32xf32>
    %380 = vector.extract_strided_slice %376 {offsets = [0, 96], sizes = [8, 32], strides = [1, 1]} : vector<8x128xf32> to vector<8x32xf32>
    %381 = arith.mulf %378, %360 : vector<8x32xf32>
    %382 = arith.mulf %377, %379 : vector<8x32xf32>
    %383 = arith.addf %381, %382 : vector<8x32xf32>
    %384 = math.tanh %383 : vector<8x32xf32>
    %385 = arith.mulf %380, %384 : vector<8x32xf32>
    %c16_i32 = arith.constant 16 : i32
    %c0_88 = arith.constant 0 : index
    %c0_89 = arith.constant 0 : index
    %386 = vector.load %arg3[%c0_88, %c0_89] : memref<32x4xf32, #tpu.memory_space<vmem>>, vector<32x4xf32>
    %cst_90 = arith.constant dense<0.000000e+00> : vector<8x4xf32>
    %387 = tpu.matmul %385, %386, %cst_90 {dimension_numbers = #tpu.dot_dimension_numbers<[1], [0], [0], [1], [0, 0, 1, 1], [], []>} : vector<8x32xf32>, vector<32x4xf32>, vector<8x4xf32> -> vector<8x4xf32>
    %c0_91 = arith.constant 0 : index
    %c0_92 = arith.constant 0 : index
    %388 = vector.load %arg4[%c0_91, %c0_92] : memref<1x4xf32, #tpu.memory_space<vmem>>, vector<1x4xf32>
    %389 = vector.broadcast %388 : vector<1x4xf32> to vector<8x4xf32>
    %390 = arith.addf %387, %389 : vector<8x4xf32>
    %cst_93 = arith.constant dense<0xFF800000> : vector<8xf32>
    %391 = vector.multi_reduction <maximumf>, %390, %cst_93 [1] : vector<8x4xf32> to vector<8xf32>
    %392 = vector.shape_cast %391 : vector<8xf32> to vector<8x1xf32>
    %393 = vector.broadcast %392 : vector<8x1xf32> to vector<8x4xf32>
    %394 = arith.subf %390, %393 : vector<8x4xf32>
    %395 = math.exp %394 : vector<8x4xf32>
    %cst_94 = arith.constant dense<0.000000e+00> : vector<8xf32>
    %396 = vector.multi_reduction <add>, %395, %cst_94 [1] : vector<8x4xf32> to vector<8xf32>
    %397 = vector.shape_cast %396 : vector<8xf32> to vector<8x1xf32>
    %398 = vector.broadcast %397 : vector<8x1xf32> to vector<8x4xf32>
    %399 = arith.divf %395, %398 : vector<8x4xf32>
    %c0_95 = arith.constant 0 : index
    %c0_96 = arith.constant 0 : index
    %400 = vector.load %arg5[%c0_95, %c0_96] : memref<8x4xf32, #tpu.memory_space<vmem>>, vector<8x4xf32>
    tpu.vector_store %arg5[%c0_95, %c0_96], %399 {strides = array<i32>} : memref<8x4xf32, #tpu.memory_space<vmem>>, vector<8x4xf32>,
    return
  }
  func.func @transform_0(%arg0: i32) -> (i32, i32, i32) {
    %c0_i32 = arith.constant 0 : i32
    %c0_i32_0 = arith.constant 0 : i32
    %c0_i32_1 = arith.constant 0 : i32
    return %c0_i32, %arg0, %c0_i32_0 : i32, i32, i32
  }
  func.func @transform_1(%arg0: i32) -> (i32, i32) {
    %c0_i32 = arith.constant 0 : i32
    %c0_i32_0 = arith.constant 0 : i32
    %c0_i32_1 = arith.constant 0 : i32
    return %c0_i32, %c0_i32_0 : i32, i32
  }
  func.func @transform_2(%arg0: i32) -> (i32, i32) {
    %c0_i32 = arith.constant 0 : i32
    %c0_i32_0 = arith.constant 0 : i32
    %c0_i32_1 = arith.constant 0 : i32
    return %c0_i32, %c0_i32_0 : i32, i32
  }
  func.func @transform_3(%arg0: i32) -> (i32, i32) {
    %c0_i32 = arith.constant 0 : i32
    %c0_i32_0 = arith.constant 0 : i32
    %c0_i32_1 = arith.constant 0 : i32
    return %c0_i32, %c0_i32_0 : i32, i32
  }
  func.func @transform_4(%arg0: i32) -> (i32, i32) {
    %c0_i32 = arith.constant 0 : i32
    %c0_i32_0 = arith.constant 0 : i32
    return %arg0, %c0_i32 : i32, i32
  }
}

</mosaic_0001>

<bundles_post_ra>
// kernel: blstm_forward.2
= control target key start
LH: loop header
LB: loop body
LE: loop exit
PB: predicated region body
PF: predicated region fallthrough
CT: control target
= control target key end

     0   :  { %12 = vsyncpa [#allocation3], 0  ;;  %s791_s0 = inlined_call_operand.vmem [shape: bf16[16,8,32], index: 0, kind: input, shape index: {}]   ;;  %s792_s1 = inlined_call_operand.vmem [shape: bf16[32,16], index: 1, kind: input, shape index: {}]   ;;  %s793_s2 = inlined_call_operand.vmem [shape: f32[1,16], index: 2, kind: input, shape index: {}]   ;;  %s794_s3 = inlined_call_operand.vmem [shape: f32[16], index: 3, kind: input, shape index: {}]   ;;  %s795_s4 = inlined_call_operand.vmem [shape: f32[16], index: 4, kind: input, shape index: {}]   ;;  %s796_s5 = inlined_call_operand.vmem [shape: bf16[16,128], index: 5, kind: input, shape index: {}]   ;;  %s797_s6 = inlined_call_operand.vmem [shape: f32[1,128], index: 6, kind: input, shape index: {}]   ;;  %s798_s7 = inlined_call_operand.vmem [shape: f32[16,8,128], index: 7, kind: output, shape index: {}]  }
   0x1   :  { %13 = vsyncpa [#allocation5], 0  ;;  %s711_s24 = smov 0  }
   0x2 LB: > { %s717_s25 = sadd.s32 4294967295, %s665_s24   ;;  %p544_p0 = scmp.ge.s32.totalorder %s665_s24, 1  ;;  %s665_s24 = sphi %s711_s24, %s19_s24  }
   0x3   : > { %p202_p1 = scmp.lt.s32.totalorder %s665_s24, 17  ;;  %s221_s28 = sshll.u32 %s794_s3, 4  ;;  %s222_s28 = int_to_ptr.vmem [resolvable:$true] %s221_s28 }
   0x4   : > { %p799_p3 = scmp.eq.s32.totalorder %s717_s25, 0  ;;  %s232_s9 = sshll.u32 %s795_s4, 4  ;;  %s233_s9 = int_to_ptr.vmem [resolvable:$true] %s232_s9 }
   0x5   : > { %p724_p2 = pnand %p544_p0, %p202_p1  ;;  %s621_s11 = scalar_lea.vmem %s222_s28, 16 }
   0x6   : > { %p622_p6 = scmp.ne.s32.totalorder %s222_s28, %s621_s11  ;;  %p629_p10 = scmp.lt.s32.totalorder %s222_s28, %s222_s28 }
   0x7   : > { %s801_s29 = scalar_select %p724_p2, 1, 0 }
   0x8   : > { %p593_p4 = pneg %p724_p2  ;;  %p630_p11 = scmp.lt.s32.totalorder %s621_s11, %s621_s11 }
   0xa   : > { %p736_p5 = pnand %p799_p3, %p593_p4  ;;  %p631_p12 = por %p630_p11, %p629_p10 }
   0xc   : > { %p623_p7 = pneg %p736_p5 }
   0xe   : > { %p624_p8 = pnand %p623_p7, %p622_p6 }
  0x10   : > { %p625_p9 = pneg %p624_p8 }
  0x12   : > { %p632_p13 = pnand %p631_p12, %p625_p9 }
  0x14   : > { %635 = shalt.err (!%p632_p13)
}
  0x15   : > { %s667_s12 = smov [#allocation2]   ;;  %s636_s13 = scalar_lea.vmem %s233_s9, 16 }
  0x16   : > { %596 = dma.vmem_to_smem (!%p736_p5), %s222_s28, 16, %s667_s12, [#allocation3]  }
  0x17   : > { %p637_p0 = scmp.ne.s32.totalorder %s233_s9, %s636_s13  ;;  %p644_p3 = scmp.lt.s32.totalorder %s233_s9, %s233_s9 }
  0x18   : > { %p645_p2 = scmp.lt.s32.totalorder %s636_s13, %s636_s13 }
  0x19   : > { %p639_p1 = pnand %p637_p0, %p623_p7 }
  0x1a   : > { %p646_p6 = por %p645_p2, %p644_p3 }
  0x1b   : > { %p640_p4 = pneg %p639_p1 }
  0x1d   : > { %p647_p8 = pnand %p646_p6, %p640_p4 }
  0x1f   : > { %650 = shalt.err (!%p647_p8)
}
  0x20   : > { %s668_s14 = smov [#allocation4]   ;;  %p803_p9 = scmp.ne.s32.totalorder %s801_s29, 0 }
  0x21   : > { %599 = dma.vmem_to_smem (!%p736_p5), %s233_s9, 16, %s668_s14, [#allocation5]  }
  0x22   : > { %258 = sbr.rel (%p803_p9) target bundleno = 927 (0x39f), region = 48  ;;  %p804_p10 = scmp.eq.s32.totalorder (!%p803_p9), %s717_s25, 0 }
  0x29   : > { %656 = dma.done.wait (%p804_p10), [#allocation3], 16   ;;  %p805_p11 = pmov %p804_p10 }
  0x2a   : > { %p806_p7 = pmov %p804_p10 }
  0x2b   : > { %658 = vsyncadd (%p805_p11), [#allocation3], 4294967280 }
  0x2c   : > { %660 = dma.done.wait (%p806_p7), [#allocation5], 16   ;;  %p807_p2 = pmov %p806_p7 }
  0x2e   : > { %662 = vsyncadd (%p807_p2), [#allocation5], 4294967280 }
  0x2f   : > { %268 = sfence }
  0x30   : > { %v616_v0 = vld [vmem:[%s792_s1] sm:$0xff]   ;;  %v669_v1 = vmov 0.0   ;;  %v617_v2 = vld [vmem:[%s792_s1 + $0x8] sm:$0xff]   ;;  %vm670_vm0 = vmmov 0   ;;  %p293_p3 = scmp.lt.s32.totalorder %s717_s25, 15  ;;  %vm326_vm1 = vcmask 261120  }
  0x31   : > { %567 = vmatprep.subr.bf16.mxu0 %v669_v1  ;;  %575 = vmatprep.subr.bf16.mxu1 %v669_v1  ;;  %v553_v4 = vld [vmem:[%s793_s2] ss:$0 sm:$0xff]  ;;  %vm370_vm2 = vcmask 130048   ;;  %s401_s9 = sld [smem:[#allocation2 + %s717_s25]] }
  0x32   : > { %568 = vmatpush3.bf16.msra.mxu0 %v616_v0  ;;  %571 = vmatprep.mubr.msk.bf16.mxu0 %vm670_vm0, %v669_v1  ;;  %s764_s19 = scalar_select %p293_p3, %s717_s25, 15  ;;  %v618_v23 = vld [vmem:[%s796_s5] sm:$0xff]  }
  0x33   : > { %569 = vmatprep.subr.bf16.mxu0 %v669_v1  ;;  %577 = vmatprep.mubr.msk.bf16.mxu1 %vm670_vm0, %v669_v1  ;;  %s404_s10 = sld [smem:[#allocation4 + %s717_s25]]  ;;  %v557_v41 = vld [vmem:[%s797_s6] ss:$0 sm:$0xff] }
  0x34   : > { %s551_s20 = sshll.u32 %s764_s19, 2  ;;  %576 = vmatpush3.bf16.msra.mxu1 %v618_v23  ;;  %s552_s11 = sshll.u32 %s764_s19, 3 }
  0x35   : > { %s296_s23 = scalar_lea.vmem %s791_s0, %s551_s20  ;;  %s300_s16 = scalar_lea.vmem %s798_s7, %s552_s11 }
  0x36   : > { %570 = vmatpush3.bf16.msra.mxu0 %v617_v2  ;;  %v302_v3 = vld [vmem:[%s296_s23] sm:$0xf] }
  0x37   : > { %v402_v35 = vstv %s401_s9 }
  0x39   : > { %572 = vmatmul.mubr.msk.bf16.vlgmr.msra.gmra.mrb[0].mxu0 %vm326_vm1, %v302_v3  ;;  %v405_v37 = vstv %s404_s10 }
 0x10c   : > { %v364_v5 = vpop.f32.mrb[0].mxu0 }
 0x10d   : > { %v365_v6 = vadd.f32 %v553_v4, %v364_v5  ;;  %v573_v7 = vpop.f32.mrb[1].mxu0 }
 0x10e   : > { %v367_v8 = vpop.f32.mrb[2].mxu0 }
 0x10f   : > { %v574_v9 = vpop.f32.mrb[3].mxu0  ;;  %v371_v10 = vsel %vm370_vm2, %v365_v6, 0.0 }
 0x110   : > { %372 = vadd.xlane.f32.xlu0 %v371_v10 }
 0x19d   : > { %v373_v11 = vpop.xlane.xlu0 %372 }
 0x19e   : > { %v374_v12 = vrot.slane %v373_v11, 4 }
 0x1a0   : > { %v375_v13 = vadd.f32 %v374_v12, %v373_v11 }
 0x1a2   : > { %v376_v14 = vrot.slane %v375_v13, 2 }
 0x1a4   : > { %v377_v15 = vadd.f32 %v376_v14, %v375_v13 }
 0x1a6   : > { %v378_v16 = vrot.slane %v377_v15, 1 }
 0x1a8   : > { %v379_v17 = vadd.f32 %v378_v16, %v377_v15 }
 0x1aa   : > { %581 = vpush %v379_v17 }
 0x1db   : > { %s582_s28 = spop %581 }
 0x1dc   : > { %v381_v18 = vstv %s582_s28 }
 0x1dd   : > { %v383_v19 = vmul.f32 0.0078125, %v381_v18 }
 0x1df   : > { %v384_v20 = vsub.f32 %v365_v6, %v383_v19 }
 0x1e1   : > { %v385_v21 = vmul.f32 %v384_v20, %v384_v20 }
 0x1e3   : > { %v386_v22 = vsel %vm370_vm2, %v385_v21, 0.0 }
 0x1e4   : > { %387 = vadd.xlane.f32.xlu0 %v386_v22 }
 0x271   : > { %v388_v24 = vpop.xlane.xlu0 %387 }
 0x272   : > { %v389_v25 = vrot.slane %v388_v24, 4 }
 0x274   : > { %v390_v26 = vadd.f32 %v389_v25, %v388_v24 }
 0x276   : > { %v391_v27 = vrot.slane %v390_v26, 2 }
 0x278   : > { %v392_v28 = vadd.f32 %v391_v27, %v390_v26 }
 0x27a   : > { %v393_v29 = vrot.slane %v392_v28, 1 }
 0x27c   : > { %v394_v30 = vadd.f32 %v393_v29, %v392_v28 }
 0x27e   : > { %583 = vpush %v394_v30 }
 0x2af   : > { %s584_s8 = spop %583 }
 0x2b0   : > { %v396_v31 = vstv %s584_s8 }
 0x2b1   : > { %v397_v32 = vmul.f32 0.0078125, %v396_v31 }
 0x2b3   : > { %v398_v33 = vadd.f32 1e-05, %v397_v32 }
 0x2b5   : > { %619 = vrsqrt.f32 %v398_v33 }
 0x2bf   : > { %v620_v34 = vpop.eup %619 }
 0x2c0   : > { %v400_v36 = vmul.f32 %v620_v34, %v384_v20 }
 0x2c2   : > { %v403_v38 = vmul.f32 %v402_v35, %v400_v36 }
 0x2c4   : > { %v406_v39 = vadd.f32 %v405_v37, %v403_v38 }
 0x2c6   : > { %v407_v40 = vpack.c.bf16 %v406_v39, %v406_v39 }
 0x2c8   : > { %578 = vmatmul.mubr.msk.bf16.vlgmr.msra.gmra.mrb[0].mxu1 %vm370_vm2, %v407_v40 }
 0x39b   : > { %v460_v42 = vpop.f32.mrb[0].mxu1 }
 0x39c   : > { %v461_v43 = vadd.f32 %v557_v41, %v460_v42  ;;  %v579_v44 = vpop.f32.mrb[1].mxu1 }
 0x39d   : > { %v463_v45 = vpop.f32.mrb[2].mxu1 }
 0x39e   : > { %466 = vst [vmem:[%s300_s16] sm:$0xff] %v461_v43  ;;  %v580_v46 = vpop.f32.mrb[3].mxu1 }
 0x39f PF: > { %s19_s24 = sadd.s32 1, %s665_s24  }
 0x3a0   : > { %p16_p5 = scmp.ge.s32.totalorder %s19_s24, 18  }
 0x3a2   :  { %18 = sbr.rel (!%p16_p5) target bundleno = 2 (0x2), region = 87 }
 0x3a9   :  { %486 = vsyncpa [#allocation3], 1 }
 0x3aa   :  { %488 = vsyncpa [#allocation3 + $0x1], 1 }
 0x3ab   :  { %489 = vsyncpa [#allocation5], 1 }

// kernel: blstm_forward.3
= control target key start
LH: loop header
LB: loop body
LE: loop exit
PB: predicated region body
PF: predicated region fallthrough
CT: control target
= control target key end

     0   :  { %v2289_v0 = vmov 0.0|0.0   ;;  %vm2290_vm0 = vmmov 0   ;;  %v2291_v4 = vmov 0.0   ;;  %v21_v8 = vlaneseq  ;;  %s2293_s24 = smov 64   ;;  %s2294_s25 = smov 32   ;;  %s2639_s1 = inlined_call_operand.vmem [shape: f32[32,128], index: 1, kind: input, shape index: {}]   ;;  %s2640_s0 = inlined_call_operand.vmem [shape: f32[16,8,128], index: 0, kind: input, shape index: {}]   ;;  %s2641_s2 = inlined_call_operand.vmem [shape: f32[32,4], index: 2, kind: input, shape index: {}]   ;;  %s2642_s3 = inlined_call_operand.vmem [shape: f32[1,4], index: 3, kind: input, shape index: {}]   ;;  %s2643_s4 = inlined_call_operand.vmem [shape: f32[8,4], index: 4, kind: output, shape index: {}]  }
   0x1   :  { %2081 = vmatprep.subr.bf16.mxu0 %v2289_v0  ;;  %v17_v1 = vld [vmem:[%s2639_s1] sm:$0xff]  ;;  %v18_v2 = vld [vmem:[%s2639_s1 + $0x8] sm:$0xff]  ;;  %v19_v3 = vld [vmem:[%s2639_s1 + $0x10] sm:$0xff]  ;;  %1902 = vmatprep.mubr.msk.f32.mxu0 %vm2290_vm0, %v2291_v4  ;;  %v2292_v11 = vmov 1.0   ;;  %vm29_vm4 = vcmask 261120   ;;  %vm1760_vm5 = vcmask 31744  }
   0x2   :  { %v2332_v5 = vpack.c.bf16 %v18_v2, %v17_v1  ;;  %v20_v6 = vld [vmem:[%s2639_s1 + $0x18] sm:$0xff]  ;;  %2087 = vmatprep.subr.bf16.mxu1 %v2289_v0  ;;  %1913 = vmatprep.mubr.msk.f32.mxu1 %vm2290_vm0, %v2291_v4  ;;  %v22_v9 = vand.u32 127, %v21_v8  ;;  %v28_v10 = vld [vmem:[%s2640_s0] sm:$0xff]  ;;  %v1777_v34 = vld [vmem:[%s2640_s0 + $0x8] sm:$0xff] }
   0x3   :  { %v2341_v7 = vpack.c.bf16 %v20_v6, %v19_v3  ;;  %v1779_v55 = vld [vmem:[%s2640_s0 + $0x10] sm:$0xff] }
   0x4   :  { %2083 = vmatpush3.bf16.msra.mxu0 %v2332_v5  ;;  %2089 = vmatpush3.bf16.msra.mxu1 %v2332_v5  ;;  %vm23_vm1 = vcmp.ge.s32.totalorder %v22_v9, 64  ;;  %vm24_vm2 = vcmp.lt.s32.totalorder %v22_v9, 96 }
   0x5   :  { %2084 = vmatprep.subr.bf16.mxu0 %v2289_v0  ;;  %2090 = vmatprep.subr.bf16.mxu1 %v2289_v0  ;;  %vm25_vm3 = vmand %vm23_vm1, %vm24_vm2 }
   0x6   :  { %v2360_v12 = vsel %vm25_vm3, 2.0, %v2292_v11  ;;  %v2364_v22 = vsel %vm25_vm3, -1.0, %v2291_v4 }
   0x8   :  { %2086 = vmatpush3.bf16.msra.mxu0 %v2341_v7  ;;  %2092 = vmatpush3.bf16.msra.mxu1 %v2341_v7 }
   0x9   :  { %2093 = vmatprep.subr.bf16.mxu0 %v2289_v0  ;;  %2099 = vmatprep.subr.bf16.mxu1 %v2289_v0 }
   0xb   :  { %1903 = vmatmul.mubr.f32.vlgmr.msra.gmra.mrb[0].mxu0 %v2291_v4 }
   0xc   :  { %2095 = vmatpush3.bf16.msra.mxu0 %v2332_v5  ;;  %1924 = vmatprep.mubr.msk.f32.mxu0 %vm2290_vm0, %v2291_v4 }
   0xd   :  { %2096 = vmatprep.subr.bf16.mxu0 %v2289_v0 }
  0x10   :  { %2098 = vmatpush3.bf16.msra.mxu0 %v2341_v7 }
  0x11   :  { %2105 = vmatprep.subr.bf16.mxu0 %v2289_v0 }
  0xde   :  { %v99_v13 = vpop.f32.mrb[0].mxu0 }
  0xdf   :  { %v103_v14 = vadd.f32 %v99_v13, %v28_v10  ;;  %v1904_v15 = vpop.f32.mrb[1].mxu0 }
  0xe1   :  { %v104_v16 = vmul.f32 %v103_v14, %v2360_v12 }
  0xe3   :  { %v105_v17 = vsub.f32 0.0, %v104_v16 }
  0xe5   :  { %v106_v18 = vmul.f32 1.442695, %v105_v17  ;;  %v1781_v17 = vld [vmem:[%s2640_s0 + $0x18] sm:$0xff] }
  0xe7   :  { %2189 = vpow2.f32 %v106_v18 }
  0xf1   :  { %v2190_v19 = vpop.eup %2189 }
  0xf2   :  { %v108_v20 = vadd.f32 1.0, %v2190_v19 }
  0xf4   :  { %2191 = vrcp.f32 %v108_v20 }
  0xfe   :  { %v2192_v21 = vpop.eup %2191 }
  0xff   :  { %v110_v23 = vmul.f32 %v2192_v21, %v2360_v12 }
 0x101   :  { %v111_v24 = vadd.f32 %v110_v23, %v2364_v22 }
 0x103   :  { %114 = vrot.lane.b32.xlu0 %v111_v24, %s2293_s24  ;;  %v112_v27 = vmul.f32 0.0, %v111_v24 }
 0x175   :  { %v115_v25 = vpop.permute.xlu0 %114 }
 0x176   :  { %v117_v26 = vmul.f32 %v115_v25, %v111_v24 }
 0x178   :  { %119 = vrot.lane.b32.xlu0 %v117_v26, %s2294_s25 }
 0x1ea   :  { %v120_v28 = vpop.permute.xlu0 %119 }
 0x1eb   :  { %v122_v29 = vadd.f32 %v120_v28, %v112_v27 }
 0x1ed   :  { %2193 = vtanh.f32 %v122_v29 }
 0x1f7   :  { %v2194_v30 = vpop.eup %2193 }
 0x1f8   :  { %125 = vrot.lane.b32.xlu1 %v2194_v30, %s2293_s24 }
 0x26a   :  { %v126_v31 = vpop.permute.xlu1 %125 }
 0x26b   :  { %v128_v32 = vmul.f32 %v126_v31, %v111_v24 }
 0x26d   :  { %132 = vrot.lane.b32.xlu1 %v128_v32, %s2294_s25 }
 0x2df   :  { %v133_v33 = vpop.permute.xlu1 %132 }
 0x2e0   :  { %1914 = vmatmul.mubr.msk.f32.vlgmr.msra.gmra.mrb[0].mxu1 %vm29_vm4, %v133_v33 }
 0x2e1   :  { %2101 = vmatpush3.bf16.msra.mxu1 %v2332_v5  ;;  %1935 = vmatprep.mubr.msk.f32.mxu1 %vm2290_vm0, %v2291_v4 }
 0x2e2   :  { %2102 = vmatprep.subr.bf16.mxu1 %v2289_v0 }
 0x2e5   :  { %2104 = vmatpush3.bf16.msra.mxu1 %v2341_v7 }
 0x2e6   :  { %2111 = vmatprep.subr.bf16.mxu1 %v2289_v0 }
 0x3b3   :  { %v202_v35 = vpop.f32.mrb[0].mxu1 }
 0x3b4   :  { %v206_v36 = vadd.f32 %v1777_v34, %v202_v35  ;;  %v1915_v37 = vpop.f32.mrb[1].mxu1 }
 0x3b6   :  { %v207_v38 = vmul.f32 %v206_v36, %v2360_v12 }
 0x3b8   :  { %v208_v39 = vsub.f32 0.0, %v207_v38 }
 0x3ba   :  { %v209_v40 = vmul.f32 1.442695, %v208_v39  ;;  %v1783_v39 = vld [vmem:[%s2640_s0 + $0x20] sm:$0xff] }
 0x3bc   :  { %2195 = vpow2.f32 %v209_v40 }
 0x3c6   :  { %v2196_v41 = vpop.eup %2195 }
 0x3c7   :  { %v211_v42 = vadd.f32 1.0, %v2196_v41 }
 0x3c9   :  { %2197 = vrcp.f32 %v211_v42 }
 0x3d3   :  { %v2198_v43 = vpop.eup %2197 }
 0x3d4   :  { %v213_v44 = vmul.f32 %v2198_v43, %v2360_v12 }
 0x3d6   :  { %v214_v45 = vadd.f32 %v213_v44, %v2364_v22 }
 0x3d8   :  { %217 = vrot.lane.b32.xlu0 %v214_v45, %s2293_s24  ;;  %v215_v48 = vmul.f32 %v214_v45, %v122_v29 }
 0x44a   :  { %v218_v46 = vpop.permute.xlu0 %217 }
 0x44b   :  { %v220_v47 = vmul.f32 %v218_v46, %v214_v45 }
 0x44d   :  { %222 = vrot.lane.b32.xlu1 %v220_v47, %s2294_s25 }
 0x4bf   :  { %v223_v49 = vpop.permute.xlu1 %222 }
 0x4c0   :  { %v225_v50 = vadd.f32 %v223_v49, %v215_v48 }
 0x4c2   :  { %2199 = vtanh.f32 %v225_v50 }
 0x4cc   :  { %v2200_v51 = vpop.eup %2199 }
 0x4cd   :  { %228 = vrot.lane.b32.xlu0 %v2200_v51, %s2293_s24 }
 0x53f   :  { %v229_v52 = vpop.permute.xlu0 %228 }
 0x540   :  { %v231_v53 = vmul.f32 %v229_v52, %v214_v45 }
 0x542   :  { %235 = vrot.lane.b32.xlu1 %v231_v53, %s2294_s25 }
 0x5b4   :  { %v236_v54 = vpop.permute.xlu1 %235 }
 0x5b5   :  { %1925 = vmatmul.mubr.msk.f32.vlgmr.msra.gmra.mrb[2].mxu0 %vm29_vm4, %v236_v54 }
 0x5b6   :  { %2107 = vmatpush3.bf16.msra.mxu0 %v2332_v5  ;;  %1946 = vmatprep.mubr.msk.f32.mxu0 %vm2290_vm0, %v2291_v4 }
 0x5b7   :  { %2108 = vmatprep.subr.bf16.mxu0 %v2289_v0 }
 0x5ba   :  { %2110 = vmatpush3.bf16.msra.mxu0 %v2341_v7 }
 0x5bb   :  { %2117 = vmatprep.subr.bf16.mxu0 %v2289_v0 }
 0x688   :  { %v305_v56 = vpop.f32.mrb[2].mxu0 }
 0x689   :  { %v309_v57 = vadd.f32 %v1779_v55, %v305_v56  ;;  %v1926_v58 = vpop.f32.mrb[3].mxu0 }
 0x68b   :  { %v310_v59 = vmul.f32 %v309_v57, %v2360_v12 }
 0x68d   :  { %v311_v60 = vsub.f32 0.0, %v310_v59 }
 0x68f   :  { %v312_v61 = vmul.f32 1.442695, %v311_v60  ;;  %v1785_v60 = vld [vmem:[%s2640_s0 + $0x28] sm:$0xff] }
 0x691   :  { %2201 = vpow2.f32 %v312_v61 }
 0x69b   :  { %v2202_v62 = vpop.eup %2201 }
 0x69c   :  { %v314_v63 = vadd.f32 1.0, %v2202_v62 }
 0x69e   :  { %2203 = vrcp.f32 %v314_v63 }
 0x6a8   :  { %v2204_v1 = vpop.eup %2203 }
 0x6a9   :  { %v316_v2 = vmul.f32 %v2204_v1, %v2360_v12 }
 0x6ab   :  { %v317_v3 = vadd.f32 %v316_v2, %v2364_v22 }
 0x6ad   :  { %320 = vrot.lane.b32.xlu0 %v317_v3, %s2293_s24  ;;  %v318_v9 = vmul.f32 %v317_v3, %v225_v50 }
 0x71f   :  { %v321_v6 = vpop.permute.xlu0 %320 }
 0x720   :  { %v323_v8 = vmul.f32 %v321_v6, %v317_v3 }
 0x722   :  { %325 = vrot.lane.b32.xlu1 %v323_v8, %s2294_s25 }
 0x794   :  { %v326_v10 = vpop.permute.xlu1 %325 }
 0x795   :  { %v328_v11 = vadd.f32 %v326_v10, %v318_v9 }
 0x797   :  { %2205 = vtanh.f32 %v328_v11 }
 0x7a1   :  { %v2206_v13 = vpop.eup %2205 }
 0x7a2   :  { %331 = vrot.lane.b32.xlu0 %v2206_v13, %s2293_s24 }
 0x814   :  { %v332_v14 = vpop.permute.xlu0 %331 }
 0x815   :  { %v334_v15 = vmul.f32 %v332_v14, %v317_v3 }
 0x817   :  { %338 = vrot.lane.b32.xlu1 %v334_v15, %s2294_s25 }
 0x889   :  { %v339_v16 = vpop.permute.xlu1 %338 }
 0x88a   :  { %1936 = vmatmul.mubr.msk.f32.vlgmr.msra.gmra.mrb[2].mxu1 %vm29_vm4, %v339_v16 }
 0x88b   :  { %2113 = vmatpush3.bf16.msra.mxu1 %v2332_v5  ;;  %1957 = vmatprep.mubr.msk.f32.mxu1 %vm2290_vm0, %v2291_v4 }
 0x88c   :  { %2114 = vmatprep.subr.bf16.mxu1 %v2289_v0 }
 0x88f   :  { %2116 = vmatpush3.bf16.msra.mxu1 %v2341_v7 }
 0x890   :  { %2123 = vmatprep.subr.bf16.mxu1 %v2289_v0 }
 0x95d   :  { %v408_v18 = vpop.f32.mrb[2].mxu1 }
 0x95e   :  { %v412_v19 = vadd.f32 %v1781_v17, %v408_v18  ;;  %v1937_v20 = vpop.f32.mrb[3].mxu1 }
 0x960   :  { %v413_v21 = vmul.f32 %v412_v19, %v2360_v12 }
 0x962   :  { %v414_v23 = vsub.f32 0.0, %v413_v21 }
 0x964   :  { %v415_v24 = vmul.f32 1.442695, %v414_v23  ;;  %v1787_v23 = vld [vmem:[%s2640_s0 + $0x30] sm:$0xff] }
 0x966   :  { %2207 = vpow2.f32 %v415_v24 }
 0x970   :  { %v2208_v25 = vpop.eup %2207 }
 0x971   :  { %v417_v26 = vadd.f32 1.0, %v2208_v25 }
 0x973   :  { %2209 = vrcp.f32 %v417_v26 }
 0x97d   :  { %v2210_v27 = vpop.eup %2209 }
 0x97e   :  { %v419_v28 = vmul.f32 %v2210_v27, %v2360_v12 }
 0x980   :  { %v420_v29 = vadd.f32 %v419_v28, %v2364_v22 }
 0x982   :  { %423 = vrot.lane.b32.xlu0 %v420_v29, %s2293_s24  ;;  %v421_v32 = vmul.f32 %v420_v29, %v328_v11 }
 0x9f4   :  { %v424_v30 = vpop.permute.xlu0 %423 }
 0x9f5   :  { %v426_v31 = vmul.f32 %v424_v30, %v420_v29 }
 0x9f7   :  { %428 = vrot.lane.b32.xlu1 %v426_v31, %s2294_s25 }
 0xa69   :  { %v429_v33 = vpop.permute.xlu1 %428 }
 0xa6a   :  { %v431_v34 = vadd.f32 %v429_v33, %v421_v32 }
 0xa6c   :  { %2211 = vtanh.f32 %v431_v34 }
 0xa76   :  { %v2212_v35 = vpop.eup %2211 }
 0xa77   :  { %434 = vrot.lane.b32.xlu0 %v2212_v35, %s2293_s24 }
 0xae9   :  { %v435_v36 = vpop.permute.xlu0 %434 }
 0xaea   :  { %v437_v37 = vmul.f32 %v435_v36, %v420_v29 }
 0xaec   :  { %441 = vrot.lane.b32.xlu1 %v437_v37, %s2294_s25 }
 0xb5e   :  { %v442_v38 = vpop.permute.xlu1 %441 }
 0xb5f   :  { %1947 = vmatmul.mubr.msk.f32.vlgmr.msra.gmra.mrb[4].mxu0 %vm29_vm4, %v442_v38 }
 0xb60   :  { %2119 = vmatpush3.bf16.msra.mxu0 %v2332_v5  ;;  %1968 = vmatprep.mubr.msk.f32.mxu0 %vm2290_vm0, %v2291_v4 }
 0xb61   :  { %2120 = vmatprep.subr.bf16.mxu0 %v2289_v0 }
 0xb64   :  { %2122 = vmatpush3.bf16.msra.mxu0 %v2341_v7 }
 0xb65   :  { %2129 = vmatprep.subr.bf16.mxu0 %v2289_v0 }
 0xc32   :  { %v511_v40 = vpop.f32.mrb[4].mxu0 }
 0xc33   :  { %v515_v41 = vadd.f32 %v1783_v39, %v511_v40  ;;  %v1948_v42 = vpop.f32.mrb[5].mxu0 }
 0xc35   :  { %v516_v43 = vmul.f32 %v515_v41, %v2360_v12 }
 0xc37   :  { %v517_v44 = vsub.f32 0.0, %v516_v43 }
 0xc39   :  { %v518_v45 = vmul.f32 1.442695, %v517_v44  ;;  %v1789_v44 = vld [vmem:[%s2640_s0 + $0x38] sm:$0xff] }
 0xc3b   :  { %2213 = vpow2.f32 %v518_v45 }
 0xc45   :  { %v2214_v46 = vpop.eup %2213 }
 0xc46   :  { %v520_v47 = vadd.f32 1.0, %v2214_v46 }
 0xc48   :  { %2215 = vrcp.f32 %v520_v47 }
 0xc52   :  { %v2216_v48 = vpop.eup %2215 }
 0xc53   :  { %v522_v49 = vmul.f32 %v2216_v48, %v2360_v12 }
 0xc55   :  { %v523_v50 = vadd.f32 %v522_v49, %v2364_v22 }
 0xc57   :  { %526 = vrot.lane.b32.xlu0 %v523_v50, %s2293_s24  ;;  %v524_v53 = vmul.f32 %v523_v50, %v431_v34 }
 0xcc9   :  { %v527_v51 = vpop.permute.xlu0 %526 }
 0xcca   :  { %v529_v52 = vmul.f32 %v527_v51, %v523_v50 }
 0xccc   :  { %531 = vrot.lane.b32.xlu1 %v529_v52, %s2294_s25 }
 0xd3e   :  { %v532_v54 = vpop.permute.xlu1 %531 }
 0xd3f   :  { %v534_v55 = vadd.f32 %v532_v54, %v524_v53 }
 0xd41   :  { %2217 = vtanh.f32 %v534_v55 }
 0xd4b   :  { %v2218_v56 = vpop.eup %2217 }
 0xd4c   :  { %537 = vrot.lane.b32.xlu0 %v2218_v56, %s2293_s24 }
 0xdbe   :  { %v538_v57 = vpop.permute.xlu0 %537 }
 0xdbf   :  { %v540_v58 = vmul.f32 %v538_v57, %v523_v50 }
 0xdc1   :  { %544 = vrot.lane.b32.xlu1 %v540_v58, %s2294_s25 }
 0xe33   :  { %v545_v59 = vpop.permute.xlu1 %544 }
 0xe34   :  { %1958 = vmatmul.mubr.msk.f32.vlgmr.msra.gmra.mrb[4].mxu1 %vm29_vm4, %v545_v59 }
 0xe35   :  { %2125 = vmatpush3.bf16.msra.mxu1 %v2332_v5  ;;  %1979 = vmatprep.mubr.msk.f32.mxu1 %vm2290_vm0, %v2291_v4 }
 0xe36   :  { %2126 = vmatprep.subr.bf16.mxu1 %v2289_v0 }
 0xe39   :  { %2128 = vmatpush3.bf16.msra.mxu1 %v2341_v7 }
 0xe3a   :  { %2135 = vmatprep.subr.bf16.mxu1 %v2289_v0 }
 0xf07   :  { %v614_v61 = vpop.f32.mrb[4].mxu1 }
 0xf08   :  { %v618_v62 = vadd.f32 %v1785_v60, %v614_v61  ;;  %v1959_v63 = vpop.f32.mrb[5].mxu1 }
 0xf0a   :  { %v619_v1 = vmul.f32 %v618_v62, %v2360_v12 }
 0xf0c   :  { %v620_v2 = vsub.f32 0.0, %v619_v1 }
 0xf0e   :  { %v621_v3 = vmul.f32 1.442695, %v620_v2  ;;  %v1791_v2 = vld [vmem:[%s2640_s0 + $0x40] sm:$0xff] }
 0xf10   :  { %2219 = vpow2.f32 %v621_v3 }
 0xf1a   :  { %v2220_v6 = vpop.eup %2219 }
 0xf1b   :  { %v623_v8 = vadd.f32 1.0, %v2220_v6 }
 0xf1d   :  { %2221 = vrcp.f32 %v623_v8 }
 0xf27   :  { %v2222_v9 = vpop.eup %2221 }
 0xf28   :  { %v625_v10 = vmul.f32 %v2222_v9, %v2360_v12 }
 0xf2a   :  { %v626_v11 = vadd.f32 %v625_v10, %v2364_v22 }
 0xf2c   :  { %629 = vrot.lane.b32.xlu0 %v626_v11, %s2293_s24  ;;  %v627_v15 = vmul.f32 %v626_v11, %v534_v55 }
 0xf9e   :  { %v630_v13 = vpop.permute.xlu0 %629 }
 0xf9f   :  { %v632_v14 = vmul.f32 %v630_v13, %v626_v11 }
 0xfa1   :  { %634 = vrot.lane.b32.xlu1 %v632_v14, %s2294_s25 }
0x1013   :  { %v635_v16 = vpop.permute.xlu1 %634 }
0x1014   :  { %v637_v17 = vadd.f32 %v635_v16, %v627_v15 }
0x1016   :  { %2223 = vtanh.f32 %v637_v17 }
0x1020   :  { %v2224_v18 = vpop.eup %2223 }
0x1021   :  { %640 = vrot.lane.b32.xlu0 %v2224_v18, %s2293_s24 }
0x1093   :  { %v641_v19 = vpop.permute.xlu0 %640 }
0x1094   :  { %v643_v20 = vmul.f32 %v641_v19, %v626_v11 }
0x1096   :  { %647 = vrot.lane.b32.xlu1 %v643_v20, %s2294_s25 }
0x1108   :  { %v648_v21 = vpop.permute.xlu1 %647 }
0x1109   :  { %1969 = vmatmul.mubr.msk.f32.vlgmr.msra.gmra.mrb[6].mxu0 %vm29_vm4, %v648_v21 }
0x110a   :  { %2131 = vmatpush3.bf16.msra.mxu0 %v2332_v5  ;;  %1990 = vmatprep.mubr.msk.f32.mxu0 %vm2290_vm0, %v2291_v4 }
0x110b   :  { %2132 = vmatprep.subr.bf16.mxu0 %v2289_v0 }
0x110e   :  { %2134 = vmatpush3.bf16.msra.mxu0 %v2341_v7 }
0x110f   :  { %2141 = vmatprep.subr.bf16.mxu0 %v2289_v0 }
0x11dc   :  { %v717_v24 = vpop.f32.mrb[6].mxu0 }
0x11dd   :  { %v721_v25 = vadd.f32 %v1787_v23, %v717_v24  ;;  %v1970_v26 = vpop.f32.mrb[7].mxu0 }
0x11df   :  { %v722_v27 = vmul.f32 %v721_v25, %v2360_v12 }
0x11e1   :  { %v723_v28 = vsub.f32 0.0, %v722_v27 }
0x11e3   :  { %v724_v29 = vmul.f32 1.442695, %v723_v28  ;;  %v1793_v28 = vld [vmem:[%s2640_s0 + $0x48] sm:$0xff] }
0x11e5   :  { %2225 = vpow2.f32 %v724_v29 }
0x11ef   :  { %v2226_v30 = vpop.eup %2225 }
0x11f0   :  { %v726_v31 = vadd.f32 1.0, %v2226_v30 }
0x11f2   :  { %2227 = vrcp.f32 %v726_v31 }
0x11fc   :  { %v2228_v32 = vpop.eup %2227 }
0x11fd   :  { %v728_v33 = vmul.f32 %v2228_v32, %v2360_v12 }
0x11ff   :  { %v729_v34 = vadd.f32 %v728_v33, %v2364_v22 }
0x1201   :  { %732 = vrot.lane.b32.xlu0 %v729_v34, %s2293_s24  ;;  %v730_v37 = vmul.f32 %v729_v34, %v637_v17 }
0x1273   :  { %v733_v35 = vpop.permute.xlu0 %732 }
0x1274   :  { %v735_v36 = vmul.f32 %v733_v35, %v729_v34 }
0x1276   :  { %737 = vrot.lane.b32.xlu1 %v735_v36, %s2294_s25 }
0x12e8   :  { %v738_v38 = vpop.permute.xlu1 %737 }
0x12e9   :  { %v740_v39 = vadd.f32 %v738_v38, %v730_v37 }
0x12eb   :  { %2229 = vtanh.f32 %v740_v39 }
0x12f5   :  { %v2230_v40 = vpop.eup %2229 }
0x12f6   :  { %743 = vrot.lane.b32.xlu0 %v2230_v40, %s2293_s24 }
0x1368   :  { %v744_v41 = vpop.permute.xlu0 %743 }
0x1369   :  { %v746_v42 = vmul.f32 %v744_v41, %v729_v34 }
0x136b   :  { %750 = vrot.lane.b32.xlu1 %v746_v42, %s2294_s25 }
0x13dd   :  { %v751_v43 = vpop.permute.xlu1 %750 }
0x13de   :  { %1980 = vmatmul.mubr.msk.f32.vlgmr.msra.gmra.mrb[6].mxu1 %vm29_vm4, %v751_v43 }
0x13df   :  { %2137 = vmatpush3.bf16.msra.mxu1 %v2332_v5  ;;  %2001 = vmatprep.mubr.msk.f32.mxu1 %vm2290_vm0, %v2291_v4 }
0x13e0   :  { %2138 = vmatprep.subr.bf16.mxu1 %v2289_v0 }
0x13e3   :  { %2140 = vmatpush3.bf16.msra.mxu1 %v2341_v7 }
0x13e4   :  { %2147 = vmatprep.subr.bf16.mxu1 %v2289_v0 }
0x14b1   :  { %v820_v45 = vpop.f32.mrb[6].mxu1 }
0x14b2   :  { %v824_v46 = vadd.f32 %v1789_v44, %v820_v45  ;;  %v1981_v47 = vpop.f32.mrb[7].mxu1 }
0x14b4   :  { %v825_v48 = vmul.f32 %v824_v46, %v2360_v12 }
0x14b6   :  { %v826_v49 = vsub.f32 0.0, %v825_v48 }
0x14b8   :  { %v827_v50 = vmul.f32 1.442695, %v826_v49  ;;  %v1795_v49 = vld [vmem:[%s2640_s0 + $0x50] sm:$0xff] }
0x14ba   :  { %2231 = vpow2.f32 %v827_v50 }
0x14c4   :  { %v2232_v51 = vpop.eup %2231 }
0x14c5   :  { %v829_v52 = vadd.f32 1.0, %v2232_v51 }
0x14c7   :  { %2233 = vrcp.f32 %v829_v52 }
0x14d1   :  { %v2234_v53 = vpop.eup %2233 }
0x14d2   :  { %v831_v54 = vmul.f32 %v2234_v53, %v2360_v12 }
0x14d4   :  { %v832_v55 = vadd.f32 %v831_v54, %v2364_v22 }
0x14d6   :  { %835 = vrot.lane.b32.xlu0 %v832_v55, %s2293_s24  ;;  %v833_v58 = vmul.f32 %v832_v55, %v740_v39 }
0x1548   :  { %v836_v56 = vpop.permute.xlu0 %835 }
0x1549   :  { %v838_v57 = vmul.f32 %v836_v56, %v832_v55 }
0x154b   :  { %840 = vrot.lane.b32.xlu1 %v838_v57, %s2294_s25 }
0x15bd   :  { %v841_v59 = vpop.permute.xlu1 %840 }
0x15be   :  { %v843_v60 = vadd.f32 %v841_v59, %v833_v58 }
0x15c0   :  { %2235 = vtanh.f32 %v843_v60 }
0x15ca   :  { %v2236_v61 = vpop.eup %2235 }
0x15cb   :  { %846 = vrot.lane.b32.xlu0 %v2236_v61, %s2293_s24 }
0x163d   :  { %v847_v62 = vpop.permute.xlu0 %846 }
0x163e   :  { %v849_v63 = vmul.f32 %v847_v62, %v832_v55 }
0x1640   :  { %853 = vrot.lane.b32.xlu1 %v849_v63, %s2294_s25 }
0x16b2   :  { %v854_v1 = vpop.permute.xlu1 %853 }
0x16b3   :  { %1991 = vmatmul.mubr.msk.f32.vlgmr.msra.gmra.mrb[8].mxu0 %vm29_vm4, %v854_v1 }
0x16b4   :  { %2143 = vmatpush3.bf16.msra.mxu0 %v2332_v5  ;;  %2012 = vmatprep.mubr.msk.f32.mxu0 %vm2290_vm0, %v2291_v4 }
0x16b5   :  { %2144 = vmatprep.subr.bf16.mxu0 %v2289_v0 }
0x16b8   :  { %2146 = vmatpush3.bf16.msra.mxu0 %v2341_v7 }
0x16b9   :  { %2153 = vmatprep.subr.bf16.mxu0 %v2289_v0 }
0x1786   :  { %v923_v3 = vpop.f32.mrb[8].mxu0 }
0x1787   :  { %v927_v6 = vadd.f32 %v1791_v2, %v923_v3  ;;  %v1992_v8 = vpop.f32.mrb[9].mxu0 }
0x1789   :  { %v928_v9 = vmul.f32 %v927_v6, %v2360_v12 }
0x178b   :  { %v929_v10 = vsub.f32 0.0, %v928_v9 }
0x178d   :  { %v930_v11 = vmul.f32 1.442695, %v929_v10  ;;  %v1797_v10 = vld [vmem:[%s2640_s0 + $0x58] sm:$0xff] }
0x178f   :  { %2237 = vpow2.f32 %v930_v11 }
0x1799   :  { %v2238_v13 = vpop.eup %2237 }
0x179a   :  { %v932_v14 = vadd.f32 1.0, %v2238_v13 }
0x179c   :  { %2239 = vrcp.f32 %v932_v14 }
0x17a6   :  { %v2240_v15 = vpop.eup %2239 }
0x17a7   :  { %v934_v16 = vmul.f32 %v2240_v15, %v2360_v12 }
0x17a9   :  { %v935_v17 = vadd.f32 %v934_v16, %v2364_v22 }
0x17ab   :  { %938 = vrot.lane.b32.xlu0 %v935_v17, %s2293_s24  ;;  %v936_v20 = vmul.f32 %v935_v17, %v843_v60 }
0x181d   :  { %v939_v18 = vpop.permute.xlu0 %938 }
0x181e   :  { %v941_v19 = vmul.f32 %v939_v18, %v935_v17 }
0x1820   :  { %943 = vrot.lane.b32.xlu1 %v941_v19, %s2294_s25 }
0x1892   :  { %v944_v21 = vpop.permute.xlu1 %943 }
0x1893   :  { %v946_v23 = vadd.f32 %v944_v21, %v936_v20 }
0x1895   :  { %2241 = vtanh.f32 %v946_v23 }
0x189f   :  { %v2242_v24 = vpop.eup %2241 }
0x18a0   :  { %949 = vrot.lane.b32.xlu0 %v2242_v24, %s2293_s24 }
0x1912   :  { %v950_v25 = vpop.permute.xlu0 %949 }
0x1913   :  { %v952_v26 = vmul.f32 %v950_v25, %v935_v17 }
0x1915   :  { %956 = vrot.lane.b32.xlu1 %v952_v26, %s2294_s25 }
0x1987   :  { %v957_v27 = vpop.permute.xlu1 %956 }
0x1988   :  { %2002 = vmatmul.mubr.msk.f32.vlgmr.msra.gmra.mrb[8].mxu1 %vm29_vm4, %v957_v27 }
0x1989   :  { %2149 = vmatpush3.bf16.msra.mxu1 %v2332_v5  ;;  %2023 = vmatprep.mubr.msk.f32.mxu1 %vm2290_vm0, %v2291_v4 }
0x198a   :  { %2150 = vmatprep.subr.bf16.mxu1 %v2289_v0 }
0x198d   :  { %2152 = vmatpush3.bf16.msra.mxu1 %v2341_v7 }
0x198e   :  { %2159 = vmatprep.subr.bf16.mxu1 %v2289_v0 }
0x1a5b   :  { %v1026_v29 = vpop.f32.mrb[8].mxu1 }
0x1a5c   :  { %v1030_v30 = vadd.f32 %v1793_v28, %v1026_v29  ;;  %v2003_v31 = vpop.f32.mrb[9].mxu1 }
0x1a5e   :  { %v1031_v32 = vmul.f32 %v1030_v30, %v2360_v12 }
0x1a60   :  { %v1032_v33 = vsub.f32 0.0, %v1031_v32 }
0x1a62   :  { %v1033_v34 = vmul.f32 1.442695, %v1032_v33  ;;  %v1799_v33 = vld [vmem:[%s2640_s0 + $0x60] sm:$0xff] }
0x1a64   :  { %2243 = vpow2.f32 %v1033_v34 }
0x1a6e   :  { %v2244_v35 = vpop.eup %2243 }
0x1a6f   :  { %v1035_v36 = vadd.f32 1.0, %v2244_v35 }
0x1a71   :  { %2245 = vrcp.f32 %v1035_v36 }
0x1a7b   :  { %v2246_v37 = vpop.eup %2245 }
0x1a7c   :  { %v1037_v38 = vmul.f32 %v2246_v37, %v2360_v12 }
0x1a7e   :  { %v1038_v39 = vadd.f32 %v1037_v38, %v2364_v22 }
0x1a80   :  { %1041 = vrot.lane.b32.xlu0 %v1038_v39, %s2293_s24  ;;  %v1039_v42 = vmul.f32 %v1038_v39, %v946_v23 }
0x1af2   :  { %v1042_v40 = vpop.permute.xlu0 %1041 }
0x1af3   :  { %v1044_v41 = vmul.f32 %v1042_v40, %v1038_v39 }
0x1af5   :  { %1046 = vrot.lane.b32.xlu1 %v1044_v41, %s2294_s25 }
0x1b67   :  { %v1047_v43 = vpop.permute.xlu1 %1046 }
0x1b68   :  { %v1049_v44 = vadd.f32 %v1047_v43, %v1039_v42 }
0x1b6a   :  { %2247 = vtanh.f32 %v1049_v44 }
0x1b74   :  { %v2248_v45 = vpop.eup %2247 }
0x1b75   :  { %1052 = vrot.lane.b32.xlu0 %v2248_v45, %s2293_s24 }
0x1be7   :  { %v1053_v46 = vpop.permute.xlu0 %1052 }
0x1be8   :  { %v1055_v47 = vmul.f32 %v1053_v46, %v1038_v39 }
0x1bea   :  { %1059 = vrot.lane.b32.xlu1 %v1055_v47, %s2294_s25 }
0x1c5c   :  { %v1060_v48 = vpop.permute.xlu1 %1059 }
0x1c5d   :  { %2013 = vmatmul.mubr.msk.f32.vlgmr.msra.gmra.mrb[10].mxu0 %vm29_vm4, %v1060_v48 }
0x1c5e   :  { %2155 = vmatpush3.bf16.msra.mxu0 %v2332_v5  ;;  %2034 = vmatprep.mubr.msk.f32.mxu0 %vm2290_vm0, %v2291_v4 }
0x1c5f   :  { %2156 = vmatprep.subr.bf16.mxu0 %v2289_v0 }
0x1c62   :  { %2158 = vmatpush3.bf16.msra.mxu0 %v2341_v7 }
0x1c63   :  { %2165 = vmatprep.subr.bf16.mxu0 %v2289_v0 }
0x1d30   :  { %v1129_v50 = vpop.f32.mrb[10].mxu0 }
0x1d31   :  { %v1133_v51 = vadd.f32 %v1795_v49, %v1129_v50  ;;  %v2014_v52 = vpop.f32.mrb[11].mxu0 }
0x1d33   :  { %v1134_v53 = vmul.f32 %v1133_v51, %v2360_v12 }
0x1d35   :  { %v1135_v54 = vsub.f32 0.0, %v1134_v53 }
0x1d37   :  { %v1136_v55 = vmul.f32 1.442695, %v1135_v54  ;;  %v1801_v54 = vld [vmem:[%s2640_s0 + $0x68] sm:$0xff] }
0x1d39   :  { %2249 = vpow2.f32 %v1136_v55 }
0x1d43   :  { %v2250_v56 = vpop.eup %2249 }
0x1d44   :  { %v1138_v57 = vadd.f32 1.0, %v2250_v56 }
0x1d46   :  { %2251 = vrcp.f32 %v1138_v57 }
0x1d50   :  { %v2252_v58 = vpop.eup %2251 }
0x1d51   :  { %v1140_v59 = vmul.f32 %v2252_v58, %v2360_v12 }
0x1d53   :  { %v1141_v60 = vadd.f32 %v1140_v59, %v2364_v22 }
0x1d55   :  { %1144 = vrot.lane.b32.xlu0 %v1141_v60, %s2293_s24  ;;  %v1142_v63 = vmul.f32 %v1141_v60, %v1049_v44 }
0x1dc7   :  { %v1145_v61 = vpop.permute.xlu0 %1144 }
0x1dc8   :  { %v1147_v62 = vmul.f32 %v1145_v61, %v1141_v60 }
0x1dca   :  { %1149 = vrot.lane.b32.xlu1 %v1147_v62, %s2294_s25 }
0x1e3c   :  { %v1150_v1 = vpop.permute.xlu1 %1149 }
0x1e3d   :  { %v1152_v2 = vadd.f32 %v1150_v1, %v1142_v63 }
0x1e3f   :  { %2253 = vtanh.f32 %v1152_v2 }
0x1e49   :  { %v2254_v3 = vpop.eup %2253 }
0x1e4a   :  { %1155 = vrot.lane.b32.xlu0 %v2254_v3, %s2293_s24 }
0x1ebc   :  { %v1156_v6 = vpop.permute.xlu0 %1155 }
0x1ebd   :  { %v1158_v8 = vmul.f32 %v1156_v6, %v1141_v60 }
0x1ebf   :  { %1162 = vrot.lane.b32.xlu1 %v1158_v8, %s2294_s25 }
0x1f31   :  { %v1163_v9 = vpop.permute.xlu1 %1162 }
0x1f32   :  { %2024 = vmatmul.mubr.msk.f32.vlgmr.msra.gmra.mrb[10].mxu1 %vm29_vm4, %v1163_v9 }
0x1f33   :  { %2161 = vmatpush3.bf16.msra.mxu1 %v2332_v5  ;;  %2045 = vmatprep.mubr.msk.f32.mxu1 %vm2290_vm0, %v2291_v4 }
0x1f34   :  { %2162 = vmatprep.subr.bf16.mxu1 %v2289_v0 }
0x1f37   :  { %2164 = vmatpush3.bf16.msra.mxu1 %v2341_v7 }
0x1f38   :  { %2171 = vmatprep.subr.bf16.mxu1 %v2289_v0 }
0x2005   :  { %v1232_v11 = vpop.f32.mrb[10].mxu1 }
0x2006   :  { %v1236_v13 = vadd.f32 %v1797_v10, %v1232_v11  ;;  %v2025_v14 = vpop.f32.mrb[11].mxu1 }
0x2007   :  { %v1803_v14 = vld [vmem:[%s2640_s0 + $0x70] sm:$0xff] }
0x2008   :  { %v1237_v15 = vmul.f32 %v1236_v13, %v2360_v12 }
0x200a   :  { %v1238_v16 = vsub.f32 0.0, %v1237_v15 }
0x200c   :  { %v1239_v17 = vmul.f32 1.442695, %v1238_v16 }
0x200e   :  { %2255 = vpow2.f32 %v1239_v17 }
0x2018   :  { %v2256_v18 = vpop.eup %2255 }
0x2019   :  { %v1241_v19 = vadd.f32 1.0, %v2256_v18 }
0x201b   :  { %2257 = vrcp.f32 %v1241_v19 }
0x2025   :  { %v2258_v20 = vpop.eup %2257 }
0x2026   :  { %v1243_v21 = vmul.f32 %v2258_v20, %v2360_v12 }
0x2028   :  { %v1244_v23 = vadd.f32 %v1243_v21, %v2364_v22 }
0x202a   :  { %1247 = vrot.lane.b32.xlu0 %v1244_v23, %s2293_s24  ;;  %v1245_v26 = vmul.f32 %v1244_v23, %v1152_v2 }
0x209c   :  { %v1248_v24 = vpop.permute.xlu0 %1247 }
0x209d   :  { %v1250_v25 = vmul.f32 %v1248_v24, %v1244_v23 }
0x209f   :  { %1252 = vrot.lane.b32.xlu1 %v1250_v25, %s2294_s25 }
0x2111   :  { %v1253_v27 = vpop.permute.xlu1 %1252 }
0x2112   :  { %v1255_v28 = vadd.f32 %v1253_v27, %v1245_v26 }
0x2114   :  { %2259 = vtanh.f32 %v1255_v28 }
0x211e   :  { %v2260_v29 = vpop.eup %2259 }
0x211f   :  { %1258 = vrot.lane.b32.xlu0 %v2260_v29, %s2293_s24 }
0x2191   :  { %v1259_v30 = vpop.permute.xlu0 %1258 }
0x2192   :  { %v1261_v31 = vmul.f32 %v1259_v30, %v1244_v23 }
0x2194   :  { %1265 = vrot.lane.b32.xlu1 %v1261_v31, %s2294_s25 }
0x2206   :  { %v1266_v32 = vpop.permute.xlu1 %1265 }
0x2207   :  { %2035 = vmatmul.mubr.msk.f32.vlgmr.msra.gmra.mrb[12].mxu0 %vm29_vm4, %v1266_v32 }
0x2208   :  { %2167 = vmatpush3.bf16.msra.mxu0 %v2332_v5  ;;  %2056 = vmatprep.mubr.msk.f32.mxu0 %vm2290_vm0, %v2291_v4 }
0x2209   :  { %2168 = vmatprep.subr.bf16.mxu0 %v2289_v0 }
0x220c   :  { %2170 = vmatpush3.bf16.msra.mxu0 %v2341_v7 }
0x220d   :  { %2177 = vmatprep.subr.bf16.mxu0 %v2289_v0 }
0x22da   :  { %v1335_v34 = vpop.f32.mrb[12].mxu0 }
0x22db   :  { %v1339_v35 = vadd.f32 %v1799_v33, %v1335_v34  ;;  %v2036_v36 = vpop.f32.mrb[13].mxu0 }
0x22dd   :  { %v1340_v37 = vmul.f32 %v1339_v35, %v2360_v12  ;;  %v1805_v35 = vld [vmem:[%s2640_s0 + $0x78] sm:$0xff] }
0x22df   :  { %v1341_v38 = vsub.f32 0.0, %v1340_v37 }
0x22e1   :  { %v1342_v39 = vmul.f32 1.442695, %v1341_v38 }
0x22e3   :  { %2261 = vpow2.f32 %v1342_v39 }
0x22ed   :  { %v2262_v40 = vpop.eup %2261 }
0x22ee   :  { %v1344_v41 = vadd.f32 1.0, %v2262_v40 }
0x22f0   :  { %2263 = vrcp.f32 %v1344_v41 }
0x22fa   :  { %v2264_v42 = vpop.eup %2263 }
0x22fb   :  { %v1346_v43 = vmul.f32 %v2264_v42, %v2360_v12 }
0x22fd   :  { %v1347_v44 = vadd.f32 %v1346_v43, %v2364_v22 }
0x22ff   :  { %1350 = vrot.lane.b32.xlu0 %v1347_v44, %s2293_s24  ;;  %v1348_v47 = vmul.f32 %v1347_v44, %v1255_v28 }
0x2371   :  { %v1351_v45 = vpop.permute.xlu0 %1350 }
0x2372   :  { %v1353_v46 = vmul.f32 %v1351_v45, %v1347_v44 }
0x2374   :  { %1355 = vrot.lane.b32.xlu1 %v1353_v46, %s2294_s25 }
0x23e6   :  { %v1356_v48 = vpop.permute.xlu1 %1355 }
0x23e7   :  { %v1358_v49 = vadd.f32 %v1356_v48, %v1348_v47 }
0x23e9   :  { %2265 = vtanh.f32 %v1358_v49 }
0x23f3   :  { %v2266_v50 = vpop.eup %2265 }
0x23f4   :  { %1361 = vrot.lane.b32.xlu0 %v2266_v50, %s2293_s24 }
0x2466   :  { %v1362_v51 = vpop.permute.xlu0 %1361 }
0x2467   :  { %v1364_v52 = vmul.f32 %v1362_v51, %v1347_v44 }
0x2469   :  { %1368 = vrot.lane.b32.xlu1 %v1364_v52, %s2294_s25  ;;  %v1674_v52 = vld [vmem:[%s2641_s2] sm:$0xff] }
0x24db   :  { %v1369_v53 = vpop.permute.xlu1 %1368 }
0x24dc   :  { %2046 = vmatmul.mubr.msk.f32.vlgmr.msra.gmra.mrb[12].mxu1 %vm29_vm4, %v1369_v53 }
0x24dd   :  { %2173 = vmatpush3.bf16.msra.mxu1 %v2332_v5  ;;  %2067 = vmatprep.mubr.msk.f32.mxu1 %vm2290_vm0, %v2291_v4 }
0x24de   :  { %2174 = vmatprep.subr.bf16.mxu1 %v2289_v0 }
0x24e1   :  { %2176 = vmatpush3.bf16.msra.mxu1 %v2341_v7 }
0x25af   :  { %v1438_v55 = vpop.f32.mrb[12].mxu1 }
0x25b0   :  { %v1442_v56 = vadd.f32 %v1801_v54, %v1438_v55  ;;  %v2047_v57 = vpop.f32.mrb[13].mxu1  ;;  %v1677_v54 = vld [vmem:[%s2641_s2 + $0x18] sm:$0xff] }
0x25b2   :  { %v1443_v58 = vmul.f32 %v1442_v56, %v2360_v12 }
0x25b4   :  { %v1444_v59 = vsub.f32 0.0, %v1443_v58 }
0x25b6   :  { %v1445_v60 = vmul.f32 1.442695, %v1444_v59 }
0x25b8   :  { %2267 = vpow2.f32 %v1445_v60  ;;  %v1807_v60 = vld [vmem:[%s2642_s3] ss:$0 sm:$0xff] }
0x25c2   :  { %v2268_v5 = vpop.eup %2267 }
0x25c3   :  { %v1447_v61 = vadd.f32 1.0, %v2268_v5 }
0x25c5   :  { %2269 = vrcp.f32 %v1447_v61 }
0x25cf   :  { %v2270_v62 = vpop.eup %2269 }
0x25d0   :  { %v1449_v63 = vmul.f32 %v2270_v62, %v2360_v12 }
0x25d2   :  { %v1450_v7 = vadd.f32 %v1449_v63, %v2364_v22 }
0x25d4   :  { %1453 = vrot.lane.b32.xlu0 %v1450_v7, %s2293_s24  ;;  %v1451_v3 = vmul.f32 %v1450_v7, %v1358_v49 }
0x2646   :  { %v1454_v1 = vpop.permute.xlu0 %1453 }
0x2647   :  { %v1456_v2 = vmul.f32 %v1454_v1, %v1450_v7 }
0x2649   :  { %1458 = vrot.lane.b32.xlu1 %v1456_v2, %s2294_s25 }
0x26bb   :  { %v1459_v6 = vpop.permute.xlu1 %1458 }
0x26bc   :  { %v1461_v8 = vadd.f32 %v1459_v6, %v1451_v3 }
0x26be   :  { %2271 = vtanh.f32 %v1461_v8 }
0x26c8   :  { %v2272_v9 = vpop.eup %2271 }
0x26c9   :  { %1464 = vrot.lane.b32.xlu0 %v2272_v9, %s2293_s24 }
0x273b   :  { %v1465_v10 = vpop.permute.xlu0 %1464 }
0x273c   :  { %v1467_v11 = vmul.f32 %v1465_v10, %v1450_v7 }
0x273e   :  { %1471 = vrot.lane.b32.xlu1 %v1467_v11, %s2294_s25 }
0x27b0   :  { %v1472_v13 = vpop.permute.xlu1 %1471 }
0x27b1   :  { %2057 = vmatmul.mubr.msk.f32.vlgmr.msra.gmra.mrb[14].mxu0 %vm29_vm4, %v1472_v13 }
0x27b2   :  { %2078 = vmatprep.mubr.msk.f32.mxu0 %vm2290_vm0, %v2291_v4 }
0x2884   :  { %v1541_v15 = vpop.f32.mrb[14].mxu0 }
0x2885   :  { %v1545_v16 = vadd.f32 %v1803_v14, %v1541_v15  ;;  %v2058_v17 = vpop.f32.mrb[15].mxu0 }
0x2887   :  { %v1546_v18 = vmul.f32 %v1545_v16, %v2360_v12 }
0x2889   :  { %v1547_v19 = vsub.f32 0.0, %v1546_v18 }
0x288b   :  { %v1548_v20 = vmul.f32 1.442695, %v1547_v19 }
0x288d   :  { %2273 = vpow2.f32 %v1548_v20 }
0x2897   :  { %v2274_v21 = vpop.eup %2273 }
0x2898   :  { %v1550_v23 = vadd.f32 1.0, %v2274_v21 }
0x289a   :  { %2275 = vrcp.f32 %v1550_v23 }
0x28a4   :  { %v2276_v24 = vpop.eup %2275 }
0x28a5   :  { %v1552_v25 = vmul.f32 %v2276_v24, %v2360_v12 }
0x28a7   :  { %v1553_v4 = vadd.f32 %v1552_v25, %v2364_v22 }
0x28a9   :  { %1556 = vrot.lane.b32.xlu0 %v1553_v4, %s2293_s24  ;;  %v1554_v28 = vmul.f32 %v1553_v4, %v1461_v8 }
0x291b   :  { %v1557_v26 = vpop.permute.xlu0 %1556 }
0x291c   :  { %v1559_v27 = vmul.f32 %v1557_v26, %v1553_v4 }
0x291e   :  { %1561 = vrot.lane.b32.xlu1 %v1559_v27, %s2294_s25 }
0x2990   :  { %v1562_v29 = vpop.permute.xlu1 %1561 }
0x2991   :  { %v1564_v30 = vadd.f32 %v1562_v29, %v1554_v28 }
0x2993   :  { %2277 = vtanh.f32 %v1564_v30 }
0x299d   :  { %v2278_v31 = vpop.eup %2277 }
0x299e   :  { %1567 = vrot.lane.b32.xlu0 %v2278_v31, %s2293_s24 }
0x2a10   :  { %v1568_v32 = vpop.permute.xlu0 %1567 }
0x2a11   :  { %v1570_v33 = vmul.f32 %v1568_v32, %v1553_v4 }
0x2a13   :  { %1574 = vrot.lane.b32.xlu1 %v1570_v33, %s2294_s25 }
0x2a85   :  { %v1575_v34 = vpop.permute.xlu1 %1574 }
0x2a86   :  { %2068 = vmatmul.mubr.msk.f32.vlgmr.msra.gmra.mrb[14].mxu1 %vm29_vm4, %v1575_v34 }
0x2b59   :  { %v1644_v36 = vpop.f32.mrb[14].mxu1 }
0x2b5a   :  { %v1648_v37 = vadd.f32 %v1805_v35, %v1644_v36  ;;  %v2069_v38 = vpop.f32.mrb[15].mxu1 }
0x2b5c   :  { %v1649_v39 = vmul.f32 %v1648_v37, %v2360_v12 }
0x2b5e   :  { %v1650_v40 = vsub.f32 0.0, %v1649_v39 }
0x2b60   :  { %v1651_v41 = vmul.f32 1.442695, %v1650_v40 }
0x2b62   :  { %2279 = vpow2.f32 %v1651_v41 }
0x2b6c   :  { %v2280_v42 = vpop.eup %2279 }
0x2b6d   :  { %v1653_v43 = vadd.f32 1.0, %v2280_v42 }
0x2b6f   :  { %2281 = vrcp.f32 %v1653_v43 }
0x2b79   :  { %v2282_v44 = vpop.eup %2281 }
0x2b7a   :  { %v1655_v45 = vmul.f32 %v2282_v44, %v2360_v12  ;;  %v1675_v12 = vld [vmem:[%s2641_s2 + $0x8] sm:$0xff] }
0x2b7b   :  { %v2178_v53 = vpack.c.bf16 %v1675_v12, %v1674_v52 }
0x2b7c   :  { %v1656_v46 = vadd.f32 %v1655_v45, %v2364_v22  ;;  %v1676_v22 = vld [vmem:[%s2641_s2 + $0x10] sm:$0xff] }
0x2b7d   :  { %2179 = vmatpush3.bf16.msra.mxu0 %v2178_v53  ;;  %v2181_v55 = vpack.c.bf16 %v1677_v54, %v1676_v22 }
0x2b7e   :  { %1659 = vrot.lane.b32.xlu0 %v1656_v46, %s2293_s24  ;;  %v1657_v49 = vmul.f32 %v1656_v46, %v1564_v30  ;;  %2180 = vmatprep.subr.bf16.mxu0 %v2289_v0 }
0x2b81   :  { %2182 = vmatpush3.bf16.msra.mxu0 %v2181_v55 }
0x2bf0   :  { %v1660_v47 = vpop.permute.xlu0 %1659 }
0x2bf1   :  { %v1662_v48 = vmul.f32 %v1660_v47, %v1656_v46 }
0x2bf3   :  { %1664 = vrot.lane.b32.xlu1 %v1662_v48, %s2294_s25 }
0x2c65   :  { %v1665_v50 = vpop.permute.xlu1 %1664 }
0x2c66   :  { %v1667_v51 = vadd.f32 %v1665_v50, %v1657_v49 }
0x2c68   :  { %2283 = vtanh.f32 %v1667_v51 }
0x2c72   :  { %v2284_v56 = vpop.eup %2283 }
0x2c73   :  { %1670 = vrot.lane.b32.xlu0 %v2284_v56, %s2293_s24 }
0x2ce5   :  { %v1671_v57 = vpop.permute.xlu0 %1670 }
0x2ce6   :  { %v1673_v58 = vmul.f32 %v1671_v57, %v1656_v46 }
0x2ce8   :  { %1686 = vrot.lane.b32.xlu1 %v1673_v58, %s2294_s25 }
0x2d5a   :  { %v1687_v59 = vpop.permute.xlu1 %1686 }
0x2d5b   :  { %2079 = vmatmul.mubr.msk.f32.vlgmr.msra.gmra.mrb[16].mxu0 %vm29_vm4, %v1687_v59 }
0x2e2e   :  { %v1756_v5 = vpop.f32.mrb[16].mxu0 }
0x2e2f   :  { %v1757_v61 = vadd.f32 %v1807_v60, %v1756_v5  ;;  %v2080_v62 = vpop.f32.mrb[17].mxu0 }
0x2e31   :  { %v1761_v0 = vsel %vm1760_vm5, %v1757_v61, -inf }
0x2e32   :  { %1762 = vmax.xlane.f32.xlu0 %v1761_v0 }
0x2ebf   :  { %v1763_v63 = vpop.xlane.xlu0 %1762 }
0x2ec0   :  { %v1764_v7 = vsub.f32 %v1757_v61, %v1763_v63 }
0x2ec2   :  { %v1765_v1 = vmul.f32 1.442695, %v1764_v7 }
0x2ec4   :  { %2285 = vpow2.f32 %v1765_v1 }
0x2ece   :  { %v2286_v2 = vpop.eup %2285 }
0x2ecf   :  { %v1767_v3 = vsel %vm1760_vm5, %v2286_v2, 0.0 }
0x2ed0   :  { %1768 = vadd.xlane.f32.xlu1 %v1767_v3 }
0x2f5d   :  { %v1769_v6 = vpop.xlane.xlu1 %1768 }
0x2f5e   :  { %2287 = vrcp.f32 %v1769_v6 }
0x2f68   :  { %v2288_v8 = vpop.eup %2287 }
0x2f69   :  { %v1771_v9 = vmul.f32 %v2288_v8, %v2286_v2 }
0x2f6b   :  { %1772 = vst.msk [vmem:[%s2643_s4] sm:$0xff] %vm1760_vm5, %v1771_v9 }

</bundles_post_ra>
